<compile_context>
chip_gen: v7x
topology: tpu7x:2x2x1
jax: 0.10.0
libtpu: 0.0.40
codegen_flags: <defaults>
</compile_context>

<pallas_src>
import functools

import jax
import jax.numpy as jnp
from jax import lax
from jax.experimental import pallas as pl
from jax.experimental.pallas import tpu as pltpu


def _round_up(x, m):
    return (x + m - 1) // m * m


# ---------------------- fused matmul + BN(+ReLU) kernel ---------------------

def _mm_affine_kernel(a_ref, b_ref, s_ref, t_ref, o_ref, *, relu):
    # Full-K matmul (bf16 x bf16 -> f32 accumulate) + per-channel affine epilogue.
    y = jnp.dot(a_ref[...], b_ref[...], preferred_element_type=jnp.float32)
    y = y * s_ref[...] + t_ref[...]
    if relu:
        y = jnp.maximum(y, 0.0)
    o_ref[...] = y


def matmul_affine(a_bf16, b_bf16, scale, shift, relu):
    """(M, K)bf16 @ (K, O)bf16 -> f32 with fused y*scale + shift (+ReLU).

    K is carried whole (no reduction grid axis); the M axis uses partial
    boundary blocks instead of padding (out-of-range rows are never stored)."""
    M, K = a_bf16.shape
    K2, O = b_bf16.shape
    assert K == K2
    tm = M if M <= 1024 else 1024            # full-M block for the small late layers
    tn = O if O <= 256 else 256              # >=2 N-tiles for the 512-channel layers
    grid = (pl.cdiv(M, tm), O // tn)
    return pl.pallas_call(
        functools.partial(_mm_affine_kernel, relu=relu),
        out_shape=jax.ShapeDtypeStruct((M, O), jnp.float32),
        grid=grid,
        in_specs=[pl.BlockSpec((tm, K), lambda i, j: (i, 0)),
                  pl.BlockSpec((K, tn), lambda i, j: (0, j)),
                  pl.BlockSpec((1, tn), lambda i, j: (0, j)),
                  pl.BlockSpec((1, tn), lambda i, j: (0, j))],
        out_specs=pl.BlockSpec((tm, tn), lambda i, j: (i, j)),
        compiler_params=pltpu.CompilerParams(
            dimension_semantics=("parallel", "parallel"),
            vmem_limit_bytes=40 * 1024 * 1024),
    )(a_bf16, b_bf16, scale.reshape(1, O), shift.reshape(1, O))


@functools.partial(jax.jit, static_argnums=(4, 5, 6, 7, 8))
def conv2d_bn(x, wm, scale, shift, kh, kw, stride, pad, relu):
    """NHWC conv with pre-flattened (K, O) bf16 weights and fused BN(+ReLU).

    K = kh*kw*Cin rounded up to a multiple of 128 (zero rows in the weights,
    matching zero columns appended to the patches inside the fused producer)."""
    B, H, W, C = x.shape
    K, O = wm.shape
    Ho = (H + 2 * pad - kh) // stride + 1
    Wo = (W + 2 * pad - kw) // stride + 1
    xb = x.astype(jnp.bfloat16)                                  # MXU operands in bf16
    if kh == 1 and kw == 1:
        pieces = [xb[:, ::stride, ::stride, :]]                  # 1x1: no im2col at all
    else:
        xp = jnp.pad(xb, ((0, 0), (pad, pad), (pad, pad), (0, 0)))
        pieces = [xp[:, i:i + (Ho - 1) * stride + 1:stride,
                     j:j + (Wo - 1) * stride + 1:stride, :]
                  for i in range(kh) for j in range(kw)]
    k0 = kh * kw * C
    if K > k0:                                                   # lane-align K to 128
        pieces.append(jnp.zeros((B, Ho, Wo, K - k0), jnp.bfloat16))
    patches = pieces[0] if len(pieces) == 1 else jnp.concatenate(pieces, axis=-1)
    patches = patches.reshape(B * Ho * Wo, K)
    y = matmul_affine(patches, wm, scale, shift, relu)
    return y.reshape(B, Ho, Wo, O)


# ------------------- residual add + SimAM + ReLU kernel ---------------------

def _res_simam_relu_kernel(x_ref, r_ref, o_ref):
    # One batch element per grid step: (HW, C) f32.
    s = x_ref[0] + r_ref[0]                               # out += residual
    hw = s.shape[0]
    ssum = jnp.sum(s, axis=0, keepdims=True)              # single-pass statistics
    ssq = jnp.sum(s * s, axis=0, keepdims=True)
    mu = ssum * (1.0 / hw)
    var = (ssq - ssum * mu) * (1.0 / (hw - 1))            # SimAM n = HW - 1
    d = (s - mu) ** 2
    inv_den = pl.reciprocal(var + 1e-4, approx=True)      # EUP, e_lambda = 1e-4
    e_inv = d * (0.25 * inv_den) + 0.5
    sig = pl.reciprocal(1.0 + jnp.exp(-e_inv), approx=True)   # sigmoid via EUP
    o_ref[0] = jnp.maximum(s * sig, 0.0)                  # final F.relu


@jax.jit
def res_simam_relu(out, residual):
    B, H, W, C = out.shape
    HW = H * W
    y = pl.pallas_call(
        _res_simam_relu_kernel,
        out_shape=jax.ShapeDtypeStruct((B, HW, C), jnp.float32),
        grid=(B,),
        in_specs=[pl.BlockSpec((1, HW, C), lambda b: (b, 0, 0)),
                  pl.BlockSpec((1, HW, C), lambda b: (b, 0, 0))],
        out_specs=pl.BlockSpec((1, HW, C), lambda b: (b, 0, 0)),
        compiler_params=pltpu.CompilerParams(
            dimension_semantics=("parallel",),
            vmem_limit_bytes=40 * 1024 * 1024),
    )(out.reshape(B, HW, C), residual.reshape(B, HW, C))
    return y.reshape(B, H, W, C)


# ----------------- avg_pool(7) -> Linear -> softmax head --------------------

def _head_kernel(x_ref, w_ref, b_ref, o_ref):
    x = jnp.mean(x_ref[...], axis=1)                           # avg_pool2d(7) == global mean
    logits = jnp.dot(x, w_ref[...],
                     preferred_element_type=jnp.float32) + b_ref[...]
    logits = logits - jnp.max(logits, axis=-1, keepdims=True)  # stable softmax
    e = jnp.exp(logits)
    o_ref[...] = e / jnp.sum(e, axis=-1, keepdims=True)        # exact divide (prob sum == 1)


@jax.jit
def head(x, w_t, bias):
    B, H, W, C = x.shape
    nc = w_t.shape[1]
    return pl.pallas_call(
        _head_kernel,
        out_shape=jax.ShapeDtypeStruct((B, nc), jnp.float32),
        grid=(1,),
        in_specs=[pl.BlockSpec((B, H * W, C), lambda i: (0, 0, 0)),
                  pl.BlockSpec((C, nc), lambda i: (0, 0)),
                  pl.BlockSpec((1, nc), lambda i: (0, 0))],
        out_specs=pl.BlockSpec((B, nc), lambda i: (0, 0)),
    )(x.reshape(B, H * W, C), w_t, bias.reshape(1, nc))


# ------------------------------ glue ops ------------------------------------

@jax.jit
def maxpool_3x3_s2_p1(x):
    # PyTorch MaxPool2d(3, 2, 1) semantics (pad with -inf, floor mode).
    return lax.reduce_window(x, jnp.array(-jnp.inf, x.dtype), lax.max,
                             window_dimensions=(1, 3, 3, 1),
                             window_strides=(1, 2, 2, 1),
                             padding=((0, 0), (1, 1), (1, 1), (0, 0)))


# --------------------------- parameters -------------------------------------

class ParamGen:
    def __init__(self, seed):
        self._key = jax.random.PRNGKey(seed)

    def _next(self):
        self._key, k = jax.random.split(self._key)
        return k

    def conv(self, cout, cin, kh, kw):
        fan_in = float(cin * kh * kw)
        return (jax.random.normal(self._next(), (cout, cin, kh, kw), jnp.float32)
                * (fan_in ** -0.5))

    def bn(self, c):
        gamma = jax.random.uniform(self._next(), (c,), jnp.float32, 0.5, 1.5)
        beta = 0.1 * jax.random.normal(self._next(), (c,), jnp.float32)
        mean = 0.1 * jax.random.normal(self._next(), (c,), jnp.float32)
        var = jax.random.uniform(self._next(), (c,), jnp.float32, 0.5, 1.5)
        scale = gamma / jnp.sqrt(var + 1e-5)
        shift = beta - mean * scale
        return scale, shift

    def conv_bn(self, cin, cout, kh, kw):
        # PyTorch (O, I, kH, kW) -> (kh*kw*Cin, O) matmul layout, K padded with
        # zero rows to a multiple of 128, cast to bf16 once at build time.
        w = self.conv(cout, cin, kh, kw)
        wm = jnp.transpose(w, (2, 3, 1, 0)).reshape(kh * kw * cin, cout)
        kp = _round_up(kh * kw * cin, 128)
        wm = jnp.pad(wm, ((0, kp - kh * kw * cin), (0, 0))).astype(jnp.bfloat16)
        scale, shift = self.bn(cout)
        return {"wm": wm, "scale": scale, "shift": shift}

    def linear(self, cin, cout):
        bound = 1.0 / (cin ** 0.5)
        w_t = jax.random.uniform(self._next(), (cin, cout), jnp.float32, -bound, bound)
        b = jax.random.uniform(self._next(), (cout,), jnp.float32, -bound, bound)
        return w_t, b


def make_block_params(pg, cin, cout, stride, with_shortcut):
    return {
        "stride": stride,
        "conv1": pg.conv_bn(cin, cout, 3, 3),
        "conv2": pg.conv_bn(cout, cout, 3, 3),
        # TODO(synk): WTConv2d(cout, cout, k=3) definition not provided; params omitted.
        "shortcut": pg.conv_bn(cin, cout, 1, 1) if with_shortcut else None,
    }


def make_layer_params(pg, cin, cout, n_blocks, stride=1):
    blocks = [make_block_params(pg, cin, cout, stride, True)]
    for _ in range(1, n_blocks):
        blocks.append(make_block_params(pg, cout, cout, 1, False))
    return blocks


def make_params(seed=0, num_classes=5):
    pg = ParamGen(seed)
    params = {
        "pre": pg.conv_bn(3, 64, 7, 7),
        "layer1": make_layer_params(pg, 64, 128, 3),
        "layer2": make_layer_params(pg, 128, 256, 4, 2),
        "layer3": make_layer_params(pg, 256, 512, 6, 2),
        "layer4": make_layer_params(pg, 512, 512, 3, 2),
    }
    params["fc_w"], params["fc_b"] = pg.linear(512, num_classes)
    return params


# ------------------------------ forward -------------------------------------

def residual_block(x, p):
    c1, c2 = p["conv1"], p["conv2"]
    out = conv2d_bn(x, c1["wm"], c1["scale"], c1["shift"], 3, 3, p["stride"], 1, True)
    out = conv2d_bn(out, c2["wm"], c2["scale"], c2["shift"], 3, 3, 1, 1, False)
    # TODO(synk): WTConv2d (wavelet-transform conv) definition not provided; identity here.
    if p["shortcut"] is not None:
        sc = p["shortcut"]
        residual = conv2d_bn(x, sc["wm"], sc["scale"], sc["shift"],
                             1, 1, p["stride"], 0, False)
    else:
        residual = x
    return res_simam_relu(out, residual)     # out += residual; SimAM; F.relu


def lung_nodule_classifier_forward(params, x_nchw):
    # PyTorch NCHW input -> NHWC for the TPU kernels.
    x = jnp.transpose(x_nchw, (0, 2, 3, 1)).astype(jnp.float32)

    # pre: Conv7x7/s2 + BN + ReLU fused -> WTConv2d (TODO) -> MaxPool3x3/s2.
    pre = params["pre"]
    out = conv2d_bn(x, pre["wm"], pre["scale"], pre["shift"], 7, 7, 2, 3, True)
    # TODO(synk): WTConv2d(64, 64, k=7) definition not provided; identity.
    out = maxpool_3x3_s2_p1(out)

    for blk in params["layer1"]:
        out = residual_block(out, blk)
    # TODO(synk): MoCAttention(55) not provided; with identity attention the
    # permute(2,3,1,0)/permute(3,2,0,1) pair cancels.  CGAFusion(128) not
    # provided; cagf1(out, out) treated as identity.
    for blk in params["layer2"]:
        out = residual_block(out, blk)
    # TODO(synk): MoCAttention(28) / CGAFusion(256) not provided; identity.
    for blk in params["layer3"]:
        out = residual_block(out, blk)
    # TODO(synk): MoCAttention(14) / CGAFusion(512) not provided; identity.
    for blk in params["layer4"]:
        out = residual_block(out, blk)
    # TODO(synk): MoCAttention(7) / CGAFusion(512) not provided; identity.

    # F.avg_pool2d(out, 7) on a 7x7 map == global mean; Dropout is eval-mode
    # identity; flatten -> Linear(512, num_classes) -> softmax, fused in one kernel.
    return head(out, params["fc_w"], params["fc_b"])


if __name__ == "__main__":
    params = make_params(seed=0)
    # Input size implied by the module: MoCAttention dims 55/28/14/7 and
    # avg_pool(7) require a 220x220 RGB input (220 -> 110 -> 55 -> 28 -> 14 -> 7).
    x = jax.random.normal(jax.random.PRNGKey(0), (2, 3, 220, 220), jnp.float32)
    probs = lung_nodule_classifier_forward(params, x)
    probs = jax.block_until_ready(probs)
    assert probs.shape == (2, 5)
    assert bool(jnp.all(jnp.isfinite(probs)))
    assert bool(jnp.allclose(jnp.sum(probs, axis=1), 1.0, atol=1e-5))
    print("KERNEL_OK")
</pallas_src>

<mosaic_0001>
module attributes {stable_mosaic.version = 11 : i64} {
  func.func @_mm_affine_kernel(%arg0: i32, %arg1: i32, %arg2: memref<1024x256xbf16, #tpu.memory_space<vmem>>, %arg3: memref<256x64xbf16, #tpu.memory_space<vmem>>, %arg4: memref<1x64xf32, #tpu.memory_space<vmem>>, %arg5: memref<1x64xf32, #tpu.memory_space<vmem>>, %arg6: memref<1024x64xf32, #tpu.memory_space<vmem>>) attributes {dimension_semantics = [#tpu.dimension_semantics<parallel>, #tpu.dimension_semantics<parallel>], iteration_bounds = array<i64: 24, 1>, scalar_prefetch = 0 : i64, scratch_operands = 0 : i64, tpu.core_type = #tpu.core_type<tc>, window_params = [{transform_indices = @transform_0, window_bounds = array<i64: 1024, 256>}, {transform_indices = @transform_1, window_bounds = array<i64: 256, 64>}, {transform_indices = @transform_2, window_bounds = array<i64: 1, 64>}, {transform_indices = @transform_3, window_bounds = array<i64: 1, 64>}, {transform_indices = @transform_4, window_bounds = array<i64: 1024, 64>}]} {
    %c0 = arith.constant 0 : index
    %c0_0 = arith.constant 0 : index
    %0 = vector.load %arg2[%c0, %c0_0] : memref<1024x256xbf16, #tpu.memory_space<vmem>>, vector<1024x256xbf16>
    %c0_1 = arith.constant 0 : index
    %c0_2 = arith.constant 0 : index
    %1 = vector.load %arg3[%c0_1, %c0_2] : memref<256x64xbf16, #tpu.memory_space<vmem>>, vector<256x64xbf16>
    %cst = arith.constant dense<0.000000e+00> : vector<1024x64xf32>
    %2 = tpu.matmul %0, %1, %cst {dimension_numbers = #tpu.dot_dimension_numbers<[1], [0], [0], [1], [0, 0, 1, 1], [], []>} : vector<1024x256xbf16>, vector<256x64xbf16>, vector<1024x64xf32> -> vector<1024x64xf32>
    %c0_3 = arith.constant 0 : index
    %c0_4 = arith.constant 0 : index
    %3 = vector.load %arg4[%c0_3, %c0_4] : memref<1x64xf32, #tpu.memory_space<vmem>>, vector<1x64xf32>
    %4 = vector.broadcast %3 : vector<1x64xf32> to vector<1024x64xf32>
    %5 = arith.mulf %2, %4 : vector<1024x64xf32>
    %c0_5 = arith.constant 0 : index
    %c0_6 = arith.constant 0 : index
    %6 = vector.load %arg5[%c0_5, %c0_6] : memref<1x64xf32, #tpu.memory_space<vmem>>, vector<1x64xf32>
    %7 = vector.broadcast %6 : vector<1x64xf32> to vector<1024x64xf32>
    %8 = arith.addf %5, %7 : vector<1024x64xf32>
    %cst_7 = arith.constant 0.000000e+00 : f32
    %9 = vector.broadcast %cst_7 : f32 to vector<1024x64xf32>
    %10 = arith.maximumf %8, %9 : vector<1024x64xf32>
    %c0_8 = arith.constant 0 : index
    %c0_9 = arith.constant 0 : index
    %11 = vector.load %arg6[%c0_8, %c0_9] : memref<1024x64xf32, #tpu.memory_space<vmem>>, vector<1024x64xf32>
    tpu.vector_store %arg6[%c0_8, %c0_9], %10 {strides = array<i32>} : memref<1024x64xf32, #tpu.memory_space<vmem>>, vector<1024x64xf32>,
    return
  }
  func.func @transform_0(%arg0: i32, %arg1: i32) -> (i32, i32) {
    %c0_i32 = arith.constant 0 : i32
    %c0_i32_0 = arith.constant 0 : i32
    return %arg0, %c0_i32 : i32, i32
  }
  func.func @transform_1(%arg0: i32, %arg1: i32) -> (i32, i32) {
    %c0_i32 = arith.constant 0 : i32
    %c0_i32_0 = arith.constant 0 : i32
    return %c0_i32, %arg1 : i32, i32
  }
  func.func @transform_2(%arg0: i32, %arg1: i32) -> (i32, i32) {
    %c0_i32 = arith.constant 0 : i32
    %c0_i32_0 = arith.constant 0 : i32
    return %c0_i32, %arg1 : i32, i32
  }
  func.func @transform_3(%arg0: i32, %arg1: i32) -> (i32, i32) {
    %c0_i32 = arith.constant 0 : i32
    %c0_i32_0 = arith.constant 0 : i32
    return %c0_i32, %arg1 : i32, i32
  }
  func.func @transform_4(%arg0: i32, %arg1: i32) -> (i32, i32) {
    %c0_i32 = arith.constant 0 : i32
    return %arg0, %arg1 : i32, i32
  }
}

</mosaic_0001>

<bundles_post_ra>
// kernel: conv2d_bn.1
= control target key start
LH: loop header
LB: loop body
LE: loop exit
PB: predicated region body
PF: predicated region fallthrough
CT: control target
= control target key end

     0   :  { %9 = vsyncpa [#allocation3], 0  ;;  %s3846_s0 = inlined_call_operand.vmem [shape: bf16[24200,256], index: 0, kind: input, shape index: {}]   ;;  %s3847_s1 = inlined_call_operand.vmem [shape: bf16[256,64], index: 1, kind: input, shape index: {}]   ;;  %s3848_s2 = inlined_call_operand.vmem [shape: f32[1,64], index: 2, kind: input, shape index: {}]   ;;  %s3849_s3 = inlined_call_operand.vmem [shape: f32[1,64], index: 3, kind: input, shape index: {}]   ;;  %s3850_s4 = inlined_call_operand.hbm [shape: f32[24200,64], index: 4, kind: output, shape index: {}]  }
   0x1   :  { %11 = vsyncpa [#allocation3 + $0x1], 0  ;;  %s2968_s15 = smov 0   ;;  %s2970_s16 = smov 0  }
   0x2   :  { %s2972_s17 = smov 0   ;;  %s2974_s18 = smov 0  }
   0x3   :  { %s2976_s19 = smov 0   ;;  %s2978_s20 = smov 0  }
   0x4 LB: > { %s2391_s21 = sadd.s32 4294967295, %s2937_s20   ;;  %s2392_s22 = sadd.s32 4294967294, %s2937_s20   ;;  %s2937_s20 = sphi %s2978_s20, %s17_s20   ;;  %s2933_s19 = sphi %s2976_s19, %s3857_s19   ;;  %s2929_s18 = sphi %s2974_s18, %s3856_s18   ;;  %s2925_s17 = sphi %s2972_s17, %s3855_s17   ;;  %s2921_s16 = sphi %s2970_s16, %s3854_s16   ;;  %s2917_s15 = sphi %s2968_s15, %s3853_s15  }
   0x5   : > { %s29_s23 = sadd.s32 1, %s2933_s19  ;;  %s142_s24 = sadd.s32 1, %s2925_s17 }
   0x6   : > { %p31_p0 = scmp.ge.s32.totalorder %s29_s23, 24  ;;  %p152_p1 = scmp.ne.s32.totalorder %s2925_s17, %s2921_s16 }
   0x7   : > { %p153_p2 = scmp.eq.s32.totalorder %s2391_s21, 23  ;;  %p158_p3 = scmp.ne.s32.totalorder %s2921_s16, %s2917_s15 }
   0x8   : > { %s3859_s23 = smov (%p31_p0, %s29_s23), 0  ;;  %p159_p5 = scmp.eq.s32.totalorder %s2392_s22, 23 }
   0x9   : > { %p3008_p4 = por %p153_p2, %p152_p1  ;;  %s137_s26 = ssub.s32 %s2933_s19, %s3859_s23 }
   0xa   : > { %p2398_p6 = scmp.ge.s32.totalorder %s2937_s20, 1  ;;  %p140_p7 = scmp.eq.s32.totalorder %s137_s26, 0 }
   0xb   : > { %p3015_p8 = por %p159_p5, %p158_p3  ;;  %p216_p9 = scmp.lt.s32.totalorder %s2937_s20, 25 }
   0xc   : > { %s3021_s28 = scalar_select %p140_p7, %s2925_s17, %s142_s24  }
   0xd   : > { %p217_p10 = pnand %p2398_p6, %p216_p9 }
   0xe   : > { %v2649_v0 = vld [vmem:[%s3847_s1] sm:$0xff] (!%p217_p10)   ;;  %v2939_v1 = vmov (!%p217_p10), 0   ;;  %s3029_s5 = sshll.u32 (!%p217_p10), %s2929_s18, 7  ;;  %v2650_v2 = vld [vmem:[%s3847_s1 + $0x8] sm:$0xff] (!%p217_p10)   ;;  %v2651_v3 = vld [vmem:[%s3847_s1 + $0x10] sm:$0xff] (!%p217_p10)   ;;  %s255_s12 = sand.u32 (!%p217_p10), 1, %s2921_s16  }
   0xf   : > { %220 = sbr.rel (%p217_p10) target bundleno = 576 (0x240), region = 36  ;;  %1187 = vmatprep.subr.bf16.mxu0 (!%p217_p10), %v2939_v1  ;;  %2560 = vmatprep.subr.bf16.mxu1 (!%p217_p10), %v2939_v1  ;;  %p264_p11 = scmp.lt.s32.totalorder (!%p217_p10), %s3029_s5, 3024  ;;  %v2652_v4 = vld [vmem:[%s3847_s1 + $0x18] sm:$0xff] (!%p217_p10)   ;;  %v2653_v5 = vld [vmem:[%s3847_s1 + $0x20] sm:$0xff] (!%p217_p10)   ;;  %v2654_v7 = vld [vmem:[%s3847_s1 + $0x28] sm:$0xff] (!%p217_p10)   ;;  %vm2130_vm0 = vcmask (!%p217_p10), 523264  }
  0x10   : > { %1188 = vmatpush1.bf16.msra.mxu0 (!%p217_p10), %v2649_v0  ;;  %2576 = vmatpush1.bf16.msra.mxu1 (!%p217_p10), %v2649_v0  ;;  %v2655_v9 = vld [vmem:[%s3847_s1 + $0x30] sm:$0xff] (!%p217_p10)   ;;  %v2656_v10 = vld [vmem:[%s3847_s1 + $0x38] sm:$0xff] (!%p217_p10)   ;;  %v2657_v11 = vld [vmem:[%s3847_s1 + $0x40] sm:$0xff] (!%p217_p10)   ;;  %s2399_s21 = sshll.u32 (!%p217_p10), %s255_s12, 10  ;;  %s3780_s8 = scalar_lea.sflag (!%p217_p10), [#allocation3], %s255_s12 }
  0x11   : > { %1189 = vmatprep.subr.bf16.mxu0 (!%p217_p10), %v2939_v1  ;;  %2561 = vmatprep.subr.bf16.mxu1 (!%p217_p10), %v2939_v1  ;;  %v2658_v12 = vld [vmem:[%s3847_s1 + $0x48] sm:$0xff] (!%p217_p10)   ;;  %v2659_v13 = vld [vmem:[%s3847_s1 + $0x50] sm:$0xff] (!%p217_p10)   ;;  %v2660_v14 = vld [vmem:[%s3847_s1 + $0x58] sm:$0xff] (!%p217_p10)   ;;  %s3248_s29 = scalar_lea.vmem (!%p217_p10), [#allocation2], %s2399_s21 }
  0x12   : > { %v2661_v15 = vld [vmem:[%s3847_s1 + $0x60] sm:$0xff] (!%p217_p10)   ;;  %v2662_v16 = vld [vmem:[%s3847_s1 + $0x68] sm:$0xff] (!%p217_p10)   ;;  %v2663_v17 = vld [vmem:[%s3847_s1 + $0x70] sm:$0xff] (!%p217_p10)  }
  0x13   : > { %v2664_v18 = vld [vmem:[%s3847_s1 + $0x78] sm:$0xff] (!%p217_p10)  }
  0x14   : > { %1190 = vmatpush1.bf16.msra.mxu0 (!%p217_p10), %v2650_v2  ;;  %2577 = vmatpush1.bf16.msra.mxu1 (!%p217_p10), %v2650_v2 }
  0x15   : > { %1191 = vmatprep.subr.bf16.mxu0 (!%p217_p10), %v2939_v1  ;;  %2562 = vmatprep.subr.bf16.mxu1 (!%p217_p10), %v2939_v1 }
  0x16   : > { %s265_s10 = scalar_select %p264_p11, %s3029_s5, 3024 }
  0x17   : > { %s2268_s9 = ssub.s32 (%p3008_p4), 3025, %s3029_s5 }
  0x18   : > { %1192 = vmatpush1.bf16.msra.mxu0 %v2651_v3  ;;  %2578 = vmatpush1.bf16.msra.mxu1 %v2651_v3  ;;  %s2558_s13 = sshll.u32 %s265_s10, 3  ;;  %p2269_p12 = scmp.lt.s32.totalorder (%p3008_p4), %s2268_s9, 128 }
  0x19   : > { %1193 = vmatprep.subr.bf16.mxu0 %v2939_v1  ;;  %2563 = vmatprep.subr.bf16.mxu1 %v2939_v1  ;;  %s3054_s26 = scalar_lea.vmem %s3846_s0, %s2558_s13 }
  0x1a   : > { %v2667_v6 = vld [vmem:[%s3054_s26 + $0x4] ss:$8 sps:$4 sm:$0xff]   ;;  %v2665_v19 = vld [vmem:[%s3054_s26] ss:$8 sps:$4 sm:$0xff]   ;;  %v2671_v21 = vld [vmem:[%s3054_s26 + $0x14] ss:$8 sps:$4 sm:$0xff]  }
  0x1b   : > { %v2670_v8 = vld [vmem:[%s3054_s26 + $0x204] ss:$8 sps:$4 sm:$0xff]   ;;  %1219 = vmatprep.mubr.bf16.mxu0 %v2667_v6  ;;  %v2668_v20 = vld [vmem:[%s3054_s26 + $0x200] ss:$8 sps:$4 sm:$0xff]   ;;  %v2673_v22 = vld [vmem:[%s3054_s26 + $0x214] ss:$8 sps:$4 sm:$0xff]  }
  0x1c   : > { %1194 = vmatpush1.bf16.msra.mxu0 %v2652_v4  ;;  %2579 = vmatpush1.bf16.msra.mxu1 %v2652_v4  ;;  %v2675_v23 = vld [vmem:[%s3054_s26 + $0x10] ss:$8 sps:$4 sm:$0xff]   ;;  %v2677_v25 = vld [vmem:[%s3054_s26 + $0x24] ss:$8 sps:$4 sm:$0xff]   ;;  %v2681_v27 = vld [vmem:[%s3054_s26 + $0x20] ss:$8 sps:$4 sm:$0xff]  }
  0x1d   : > { %1195 = vmatprep.subr.bf16.mxu0 %v2939_v1  ;;  %2564 = vmatprep.subr.bf16.mxu1 %v2939_v1  ;;  %v2676_v24 = vld [vmem:[%s3054_s26 + $0x210] ss:$8 sps:$4 sm:$0xff]   ;;  %v2679_v26 = vld [vmem:[%s3054_s26 + $0x224] ss:$8 sps:$4 sm:$0xff]   ;;  %v2682_v28 = vld [vmem:[%s3054_s26 + $0x220] ss:$8 sps:$4 sm:$0xff]  }
  0x1e   : > { %1475 = vmatprep.mubr.bf16.mxu1 %v2670_v8  ;;  %v2683_v29 = vld [vmem:[%s3054_s26 + $0x34] ss:$8 sps:$4 sm:$0xff]   ;;  %v2687_v31 = vld [vmem:[%s3054_s26 + $0x30] ss:$8 sps:$4 sm:$0xff]   ;;  %v2689_v33 = vld [vmem:[%s3054_s26 + $0x44] ss:$8 sps:$4 sm:$0xff]  }
  0x1f   : > { %v2685_v30 = vld [vmem:[%s3054_s26 + $0x234] ss:$8 sps:$4 sm:$0xff]   ;;  %v2688_v32 = vld [vmem:[%s3054_s26 + $0x230] ss:$8 sps:$4 sm:$0xff]   ;;  %v2691_v34 = vld [vmem:[%s3054_s26 + $0x244] ss:$8 sps:$4 sm:$0xff]  }
  0x20   : > { %1196 = vmatpush1.bf16.msra.mxu0 %v2653_v5  ;;  %2580 = vmatpush1.bf16.msra.mxu1 %v2653_v5  ;;  %v2693_v35 = vld [vmem:[%s3054_s26 + $0x40] ss:$8 sps:$4 sm:$0xff]   ;;  %v2695_v37 = vld [vmem:[%s3054_s26 + $0x54] ss:$8 sps:$4 sm:$0xff]   ;;  %v2699_v39 = vld [vmem:[%s3054_s26 + $0x50] ss:$8 sps:$4 sm:$0xff]  }
  0x21   : > { %1197 = vmatprep.subr.bf16.mxu0 %v2939_v1  ;;  %2565 = vmatprep.subr.bf16.mxu1 %v2939_v1  ;;  %v2694_v36 = vld [vmem:[%s3054_s26 + $0x240] ss:$8 sps:$4 sm:$0xff]   ;;  %v2697_v38 = vld [vmem:[%s3054_s26 + $0x254] ss:$8 sps:$4 sm:$0xff]   ;;  %v2700_v40 = vld [vmem:[%s3054_s26 + $0x250] ss:$8 sps:$4 sm:$0xff]  }
  0x22   : > { %v2701_v41 = vld [vmem:[%s3054_s26 + $0x64] ss:$8 sps:$4 sm:$0xff]   ;;  %v2705_v43 = vld [vmem:[%s3054_s26 + $0x60] ss:$8 sps:$4 sm:$0xff]   ;;  %v2707_v45 = vld [vmem:[%s3054_s26 + $0x74] ss:$8 sps:$4 sm:$0xff]  }
  0x23   : > { %v2703_v42 = vld [vmem:[%s3054_s26 + $0x264] ss:$8 sps:$4 sm:$0xff]   ;;  %v2706_v44 = vld [vmem:[%s3054_s26 + $0x260] ss:$8 sps:$4 sm:$0xff]   ;;  %v2709_v46 = vld [vmem:[%s3054_s26 + $0x274] ss:$8 sps:$4 sm:$0xff]  }
  0x24   : > { %1198 = vmatpush1.bf16.msra.mxu0 %v2654_v7  ;;  %2581 = vmatpush1.bf16.msra.mxu1 %v2654_v7  ;;  %v2711_v47 = vld [vmem:[%s3054_s26 + $0x70] ss:$8 sps:$4 sm:$0xff]   ;;  %v2713_v49 = vld [vmem:[%s3054_s26 + $0x84] ss:$8 sps:$4 sm:$0xff]   ;;  %v2717_v51 = vld [vmem:[%s3054_s26 + $0x80] ss:$8 sps:$4 sm:$0xff]  }
  0x25   : > { %1199 = vmatprep.subr.bf16.mxu0 %v2939_v1  ;;  %2566 = vmatprep.subr.bf16.mxu1 %v2939_v1  ;;  %v2712_v48 = vld [vmem:[%s3054_s26 + $0x270] ss:$8 sps:$4 sm:$0xff]   ;;  %v2715_v50 = vld [vmem:[%s3054_s26 + $0x284] ss:$8 sps:$4 sm:$0xff]   ;;  %v2718_v52 = vld [vmem:[%s3054_s26 + $0x280] ss:$8 sps:$4 sm:$0xff]  }
  0x26   : > { %v2719_v53 = vld [vmem:[%s3054_s26 + $0x94] ss:$8 sps:$4 sm:$0xff]   ;;  %v2723_v55 = vld [vmem:[%s3054_s26 + $0x90] ss:$8 sps:$4 sm:$0xff]   ;;  %v2725_v57 = vld [vmem:[%s3054_s26 + $0xa4] ss:$8 sps:$4 sm:$0xff]  }
  0x27   : > { %v2721_v54 = vld [vmem:[%s3054_s26 + $0x294] ss:$8 sps:$4 sm:$0xff]   ;;  %v2724_v56 = vld [vmem:[%s3054_s26 + $0x290] ss:$8 sps:$4 sm:$0xff]   ;;  %v2727_v58 = vld [vmem:[%s3054_s26 + $0x2a4] ss:$8 sps:$4 sm:$0xff]  }
  0x28   : > { %1200 = vmatpush1.bf16.msra.mxu0 %v2655_v9  ;;  %2582 = vmatpush1.bf16.msra.mxu1 %v2655_v9  ;;  %v2729_v59 = vld [vmem:[%s3054_s26 + $0xa0] ss:$8 sps:$4 sm:$0xff]   ;;  %v2731_v61 = vld [vmem:[%s3054_s26 + $0xb4] ss:$8 sps:$4 sm:$0xff]   ;;  %v2735_v63 = vld [vmem:[%s3054_s26 + $0xb0] ss:$8 sps:$4 sm:$0xff]  }
  0x29   : > { %1201 = vmatprep.subr.bf16.mxu0 %v2939_v1  ;;  %2567 = vmatprep.subr.bf16.mxu1 %v2939_v1  ;;  %v2730_v60 = vld [vmem:[%s3054_s26 + $0x2a0] ss:$8 sps:$4 sm:$0xff]   ;;  %v2733_v62 = vld [vmem:[%s3054_s26 + $0x2b4] ss:$8 sps:$4 sm:$0xff]   ;;  %v2736_v0 = vld [vmem:[%s3054_s26 + $0x2b0] ss:$8 sps:$4 sm:$0xff]  }
  0x2a   : > { %v2739_v2 = vld [vmem:[%s3054_s26 + $0x2c4] ss:$8 sps:$4 sm:$0xff]   ;;  %v2741_v3 = vld [vmem:[%s3054_s26 + $0xc0] ss:$8 sps:$4 sm:$0xff]   ;;  %v2743_v5 = vld [vmem:[%s3054_s26 + $0xd4] ss:$8 sps:$4 sm:$0xff]  }
  0x2b   : > { %v2742_v4 = vld [vmem:[%s3054_s26 + $0x2c0] ss:$8 sps:$4 sm:$0xff]   ;;  %v2745_v6 = vld [vmem:[%s3054_s26 + $0x2d4] ss:$8 sps:$4 sm:$0xff]   ;;  %v2747_v7 = vld [vmem:[%s3054_s26 + $0xd0] ss:$8 sps:$4 sm:$0xff]  }
  0x2c   : > { %1202 = vmatpush1.bf16.msra.mxu0 %v2656_v10  ;;  %2583 = vmatpush1.bf16.msra.mxu1 %v2656_v10  ;;  %v2748_v8 = vld [vmem:[%s3054_s26 + $0x2d0] ss:$8 sps:$4 sm:$0xff]   ;;  %v2749_v9 = vld [vmem:[%s3054_s26 + $0xe4] ss:$8 sps:$4 sm:$0xff]  }
  0x2d   : > { %1203 = vmatprep.subr.bf16.mxu0 %v2939_v1  ;;  %2568 = vmatprep.subr.bf16.mxu1 %v2939_v1  ;;  %v2751_v10 = vld [vmem:[%s3054_s26 + $0x2e4] ss:$8 sps:$4 sm:$0xff]  }
  0x30   : > { %1204 = vmatpush1.bf16.msra.mxu0 %v2657_v11  ;;  %2584 = vmatpush1.bf16.msra.mxu1 %v2657_v11  ;;  %v2753_v11 = vld [vmem:[%s3054_s26 + $0xe0] ss:$8 sps:$4 sm:$0xff]  }
  0x31   : > { %1205 = vmatprep.subr.bf16.mxu0 %v2939_v1  ;;  %2569 = vmatprep.subr.bf16.mxu1 %v2939_v1 }
  0x34   : > { %1206 = vmatpush1.bf16.msra.mxu0 %v2658_v12  ;;  %2585 = vmatpush1.bf16.msra.mxu1 %v2658_v12  ;;  %v2754_v12 = vld [vmem:[%s3054_s26 + $0x2e0] ss:$8 sps:$4 sm:$0xff]  }
  0x35   : > { %1207 = vmatprep.subr.bf16.mxu0 %v2939_v1  ;;  %2570 = vmatprep.subr.bf16.mxu1 %v2939_v1 }
  0x38   : > { %1208 = vmatpush1.bf16.msra.mxu0 %v2659_v13  ;;  %2586 = vmatpush1.bf16.msra.mxu1 %v2659_v13  ;;  %v2755_v13 = vld [vmem:[%s3054_s26 + $0xf4] ss:$8 sps:$4 sm:$0xff]  }
  0x39   : > { %1209 = vmatprep.subr.bf16.mxu0 %v2939_v1  ;;  %2571 = vmatprep.subr.bf16.mxu1 %v2939_v1 }
  0x3c   : > { %1210 = vmatpush1.bf16.msra.mxu0 %v2660_v14  ;;  %2587 = vmatpush1.bf16.msra.mxu1 %v2660_v14  ;;  %v2757_v14 = vld [vmem:[%s3054_s26 + $0x2f4] ss:$8 sps:$4 sm:$0xff]  }
  0x3d   : > { %1211 = vmatprep.subr.bf16.mxu0 %v2939_v1  ;;  %2572 = vmatprep.subr.bf16.mxu1 %v2939_v1 }
  0x40   : > { %1212 = vmatpush1.bf16.msra.mxu0 %v2661_v15  ;;  %2588 = vmatpush1.bf16.msra.mxu1 %v2661_v15  ;;  %v2759_v15 = vld [vmem:[%s3054_s26 + $0xf0] ss:$8 sps:$4 sm:$0xff]  }
  0x41   : > { %1213 = vmatprep.subr.bf16.mxu0 %v2939_v1  ;;  %2573 = vmatprep.subr.bf16.mxu1 %v2939_v1 }
  0x44   : > { %1214 = vmatpush1.bf16.msra.mxu0 %v2662_v16  ;;  %2589 = vmatpush1.bf16.msra.mxu1 %v2662_v16  ;;  %v2760_v16 = vld [vmem:[%s3054_s26 + $0x2f0] ss:$8 sps:$4 sm:$0xff]  }
  0x45   : > { %1215 = vmatprep.subr.bf16.mxu0 %v2939_v1  ;;  %2574 = vmatprep.subr.bf16.mxu1 %v2939_v1 }
  0x48   : > { %1216 = vmatpush1.bf16.msra.mxu0 %v2663_v17  ;;  %2590 = vmatpush1.bf16.msra.mxu1 %v2663_v17  ;;  %v2761_v17 = vld [vmem:[%s3054_s26 + $0x104] ss:$8 sps:$4 sm:$0xff]  }
  0x49   : > { %1217 = vmatprep.subr.bf16.mxu0 %v2939_v1  ;;  %2575 = vmatprep.subr.bf16.mxu1 %v2939_v1  ;;  %v2737_v1 = vld [vmem:[%s3054_s26 + $0xc4] ss:$8 sps:$4 sm:$0xff]  }
  0x4c   : > { %1218 = vmatpush1.bf16.msra.mxu0 %v2664_v18  ;;  %2591 = vmatpush1.bf16.msra.mxu1 %v2664_v18  ;;  %v2763_v18 = vld [vmem:[%s3054_s26 + $0x304] ss:$8 sps:$4 sm:$0xff]  }
  0x4f   : > { %1220 = vmatmul.mubr.bf16.vlgmr.msra.gmra.mrb[0].mxu0 %v2665_v19  ;;  %1476 = vmatmul.mubr.bf16.vlgmr.msra.gmra.mrb[0].mxu1 %v2668_v20  ;;  %v2765_v19 = vld [vmem:[%s3054_s26 + $0x100] ss:$8 sps:$4 sm:$0xff]  }
  0x50   : > { %1227 = vmatprep.mubr.bf16.mxu0 %v2671_v21  ;;  %1483 = vmatprep.mubr.bf16.mxu1 %v2673_v22  ;;  %v2766_v20 = vld [vmem:[%s3054_s26 + $0x300] ss:$8 sps:$4 sm:$0xff]   ;;  %v2767_v21 = vld [vmem:[%s3054_s26 + $0x114] ss:$8 sps:$4 sm:$0xff]  }
  0x51   : > { %v2769_v22 = vld [vmem:[%s3054_s26 + $0x314] ss:$8 sps:$4 sm:$0xff]  }
  0x57   : > { %1228 = vmatmul.mubr.bf16.gmra.mrb[4].mxu0 %v2675_v23  ;;  %1484 = vmatmul.mubr.bf16.gmra.mrb[4].mxu1 %v2676_v24  ;;  %v2771_v23 = vld [vmem:[%s3054_s26 + $0x110] ss:$8 sps:$4 sm:$0xff]  }
  0x58   : > { %1235 = vmatprep.mubr.bf16.mxu0 %v2677_v25  ;;  %1491 = vmatprep.mubr.bf16.mxu1 %v2679_v26  ;;  %v2772_v24 = vld [vmem:[%s3054_s26 + $0x310] ss:$8 sps:$4 sm:$0xff]   ;;  %v2773_v25 = vld [vmem:[%s3054_s26 + $0x124] ss:$8 sps:$4 sm:$0xff]  }
  0x59   : > { %v2775_v26 = vld [vmem:[%s3054_s26 + $0x324] ss:$8 sps:$4 sm:$0xff]  }
  0x5f   : > { %1236 = vmatmul.mubr.bf16.gmra.mrb[8].mxu0 %v2681_v27  ;;  %1492 = vmatmul.mubr.bf16.gmra.mrb[8].mxu1 %v2682_v28  ;;  %v2777_v27 = vld [vmem:[%s3054_s26 + $0x120] ss:$8 sps:$4 sm:$0xff]  }
  0x60   : > { %1243 = vmatprep.mubr.bf16.mxu0 %v2683_v29  ;;  %1499 = vmatprep.mubr.bf16.mxu1 %v2685_v30  ;;  %v2778_v28 = vld [vmem:[%s3054_s26 + $0x320] ss:$8 sps:$4 sm:$0xff]   ;;  %v2779_v29 = vld [vmem:[%s3054_s26 + $0x134] ss:$8 sps:$4 sm:$0xff]  }
  0x61   : > { %v2781_v30 = vld [vmem:[%s3054_s26 + $0x334] ss:$8 sps:$4 sm:$0xff]  }
  0x67   : > { %1244 = vmatmul.mubr.bf16.gmra.mrb[12].mxu0 %v2687_v31  ;;  %1500 = vmatmul.mubr.bf16.gmra.mrb[12].mxu1 %v2688_v32  ;;  %v2783_v31 = vld [vmem:[%s3054_s26 + $0x130] ss:$8 sps:$4 sm:$0xff]  }
  0x68   : > { %1251 = vmatprep.mubr.bf16.mxu0 %v2689_v33  ;;  %1507 = vmatprep.mubr.bf16.mxu1 %v2691_v34  ;;  %v2784_v32 = vld [vmem:[%s3054_s26 + $0x330] ss:$8 sps:$4 sm:$0xff]   ;;  %v2785_v33 = vld [vmem:[%s3054_s26 + $0x144] ss:$8 sps:$4 sm:$0xff]  }
  0x69   : > { %v2787_v34 = vld [vmem:[%s3054_s26 + $0x344] ss:$8 sps:$4 sm:$0xff]  }
  0x6f   : > { %1252 = vmatmul.mubr.bf16.gmra.mrb[16].mxu0 %v2693_v35  ;;  %1508 = vmatmul.mubr.bf16.gmra.mrb[16].mxu1 %v2694_v36  ;;  %v2789_v35 = vld [vmem:[%s3054_s26 + $0x140] ss:$8 sps:$4 sm:$0xff]  }
  0x70   : > { %1259 = vmatprep.mubr.bf16.mxu0 %v2695_v37  ;;  %1515 = vmatprep.mubr.bf16.mxu1 %v2697_v38  ;;  %v2790_v36 = vld [vmem:[%s3054_s26 + $0x340] ss:$8 sps:$4 sm:$0xff]   ;;  %v2791_v37 = vld [vmem:[%s3054_s26 + $0x154] ss:$8 sps:$4 sm:$0xff]  }
  0x71   : > { %v2793_v38 = vld [vmem:[%s3054_s26 + $0x354] ss:$8 sps:$4 sm:$0xff]  }
  0x77   : > { %1260 = vmatmul.mubr.bf16.gmra.mrb[20].mxu0 %v2699_v39  ;;  %1516 = vmatmul.mubr.bf16.gmra.mrb[20].mxu1 %v2700_v40  ;;  %v2795_v39 = vld [vmem:[%s3054_s26 + $0x150] ss:$8 sps:$4 sm:$0xff]  }
  0x78   : > { %1267 = vmatprep.mubr.bf16.mxu0 %v2701_v41  ;;  %1523 = vmatprep.mubr.bf16.mxu1 %v2703_v42  ;;  %v2796_v40 = vld [vmem:[%s3054_s26 + $0x350] ss:$8 sps:$4 sm:$0xff]   ;;  %v2797_v41 = vld [vmem:[%s3054_s26 + $0x164] ss:$8 sps:$4 sm:$0xff]  }
  0x79   : > { %v2799_v42 = vld [vmem:[%s3054_s26 + $0x364] ss:$8 sps:$4 sm:$0xff]  }
  0x7f   : > { %1268 = vmatmul.mubr.bf16.gmra.mrb[24].mxu0 %v2705_v43  ;;  %1524 = vmatmul.mubr.bf16.gmra.mrb[24].mxu1 %v2706_v44  ;;  %v2801_v43 = vld [vmem:[%s3054_s26 + $0x160] ss:$8 sps:$4 sm:$0xff]  }
  0x80   : > { %1275 = vmatprep.mubr.bf16.mxu0 %v2707_v45  ;;  %1531 = vmatprep.mubr.bf16.mxu1 %v2709_v46  ;;  %v2802_v44 = vld [vmem:[%s3054_s26 + $0x360] ss:$8 sps:$4 sm:$0xff]   ;;  %v2803_v45 = vld [vmem:[%s3054_s26 + $0x174] ss:$8 sps:$4 sm:$0xff]  }
  0x81   : > { %v2805_v46 = vld [vmem:[%s3054_s26 + $0x374] ss:$8 sps:$4 sm:$0xff]  }
  0x87   : > { %1276 = vmatmul.mubr.bf16.gmra.mrb[28].mxu0 %v2711_v47  ;;  %1532 = vmatmul.mubr.bf16.gmra.mrb[28].mxu1 %v2712_v48  ;;  %v2807_v47 = vld [vmem:[%s3054_s26 + $0x170] ss:$8 sps:$4 sm:$0xff]  }
  0x88   : > { %1283 = vmatprep.mubr.bf16.mxu0 %v2713_v49  ;;  %1539 = vmatprep.mubr.bf16.mxu1 %v2715_v50  ;;  %v2808_v48 = vld [vmem:[%s3054_s26 + $0x370] ss:$8 sps:$4 sm:$0xff]   ;;  %v2809_v49 = vld [vmem:[%s3054_s26 + $0x184] ss:$8 sps:$4 sm:$0xff]  }
  0x89   : > { %v2811_v50 = vld [vmem:[%s3054_s26 + $0x384] ss:$8 sps:$4 sm:$0xff]  }
  0x8f   : > { %1284 = vmatmul.mubr.bf16.gmra.mrb[32].mxu0 %v2717_v51  ;;  %1540 = vmatmul.mubr.bf16.gmra.mrb[32].mxu1 %v2718_v52  ;;  %v2813_v51 = vld [vmem:[%s3054_s26 + $0x180] ss:$8 sps:$4 sm:$0xff]  }
  0x90   : > { %1291 = vmatprep.mubr.bf16.mxu0 %v2719_v53  ;;  %1547 = vmatprep.mubr.bf16.mxu1 %v2721_v54  ;;  %v2814_v52 = vld [vmem:[%s3054_s26 + $0x380] ss:$8 sps:$4 sm:$0xff]   ;;  %v2815_v53 = vld [vmem:[%s3054_s26 + $0x194] ss:$8 sps:$4 sm:$0xff]  }
  0x91   : > { %v2817_v54 = vld [vmem:[%s3054_s26 + $0x394] ss:$8 sps:$4 sm:$0xff]  }
  0x97   : > { %1292 = vmatmul.mubr.bf16.gmra.mrb[36].mxu0 %v2723_v55  ;;  %1548 = vmatmul.mubr.bf16.gmra.mrb[36].mxu1 %v2724_v56  ;;  %v2819_v55 = vld [vmem:[%s3054_s26 + $0x190] ss:$8 sps:$4 sm:$0xff]  }
  0x98   : > { %1299 = vmatprep.mubr.bf16.mxu0 %v2725_v57  ;;  %1555 = vmatprep.mubr.bf16.mxu1 %v2727_v58  ;;  %v2820_v56 = vld [vmem:[%s3054_s26 + $0x390] ss:$8 sps:$4 sm:$0xff]   ;;  %v2821_v57 = vld [vmem:[%s3054_s26 + $0x1a4] ss:$8 sps:$4 sm:$0xff]  }
  0x99   : > { %v2823_v58 = vld [vmem:[%s3054_s26 + $0x3a4] ss:$8 sps:$4 sm:$0xff]  }
  0x9f   : > { %1300 = vmatmul.mubr.bf16.gmra.mrb[40].mxu0 %v2729_v59  ;;  %1556 = vmatmul.mubr.bf16.gmra.mrb[40].mxu1 %v2730_v60  ;;  %v2825_v59 = vld [vmem:[%s3054_s26 + $0x1a0] ss:$8 sps:$4 sm:$0xff]  }
  0xa0   : > { %1307 = vmatprep.mubr.bf16.mxu0 %v2731_v61  ;;  %1563 = vmatprep.mubr.bf16.mxu1 %v2733_v62  ;;  %v2826_v60 = vld [vmem:[%s3054_s26 + $0x3a0] ss:$8 sps:$4 sm:$0xff]   ;;  %v2827_v61 = vld [vmem:[%s3054_s26 + $0x1b4] ss:$8 sps:$4 sm:$0xff]  }
  0xa1   : > { %v2829_v62 = vld [vmem:[%s3054_s26 + $0x3b4] ss:$8 sps:$4 sm:$0xff]  }
  0xa7   : > { %1308 = vmatmul.mubr.bf16.gmra.mrb[44].mxu0 %v2735_v63  ;;  %1564 = vmatmul.mubr.bf16.gmra.mrb[44].mxu1 %v2736_v0  ;;  %v3227_v63 = vld [vmem:[%s3848_s2] ss:$0 sm:$0xff] }
  0xa8   : > { %1315 = vmatprep.mubr.bf16.mxu0 %v2737_v1  ;;  %1571 = vmatprep.mubr.bf16.mxu1 %v2739_v2  ;;  %v3234_v1 = vld [vmem:[%s3849_s3] ss:$0 sm:$0xff] }
  0xaf   : > { %1316 = vmatmul.mubr.bf16.gmra.mrb[48].mxu0 %v2741_v3  ;;  %1572 = vmatmul.mubr.bf16.gmra.mrb[48].mxu1 %v2742_v4 }
  0xb0   : > { %1323 = vmatprep.mubr.bf16.mxu0 %v2743_v5  ;;  %1579 = vmatprep.mubr.bf16.mxu1 %v2745_v6 }
  0xb7   : > { %1324 = vmatmul.mubr.bf16.gmra.mrb[52].mxu0 %v2747_v7  ;;  %1580 = vmatmul.mubr.bf16.gmra.mrb[52].mxu1 %v2748_v8  ;;  %v2831_v7 = vld [vmem:[%s3054_s26 + $0x1b0] ss:$8 sps:$4 sm:$0xff]  }
  0xb8   : > { %1331 = vmatprep.mubr.bf16.mxu0 %v2749_v9  ;;  %1587 = vmatprep.mubr.bf16.mxu1 %v2751_v10  ;;  %v2832_v8 = vld [vmem:[%s3054_s26 + $0x3b0] ss:$8 sps:$4 sm:$0xff]  }
  0xbf   : > { %1332 = vmatmul.mubr.bf16.gmra.mrb[56].mxu0 %v2753_v11  ;;  %1588 = vmatmul.mubr.bf16.gmra.mrb[56].mxu1 %v2754_v12  ;;  %v2833_v11 = vld [vmem:[%s3054_s26 + $0x1c4] ss:$8 sps:$4 sm:$0xff]  }
  0xc0   : > { %1339 = vmatprep.mubr.bf16.mxu0 %v2755_v13  ;;  %1595 = vmatprep.mubr.bf16.mxu1 %v2757_v14  ;;  %v2835_v12 = vld [vmem:[%s3054_s26 + $0x3c4] ss:$8 sps:$4 sm:$0xff]  }
  0xc7   : > { %1340 = vmatmul.mubr.bf16.gmra.mrb[60].mxu0 %v2759_v15  ;;  %1596 = vmatmul.mubr.bf16.gmra.mrb[60].mxu1 %v2760_v16 }
  0xc8   : > { %1347 = vmatprep.mubr.bf16.mxu0 %v2761_v17  ;;  %1603 = vmatprep.mubr.bf16.mxu1 %v2763_v18 }
  0xcf   : > { %1348 = vmatmul.mubr.bf16.gmra.mrb[64].mxu0 %v2765_v19  ;;  %1604 = vmatmul.mubr.bf16.gmra.mrb[64].mxu1 %v2766_v20 }
  0xd0   : > { %1355 = vmatprep.mubr.bf16.mxu0 %v2767_v21  ;;  %1611 = vmatprep.mubr.bf16.mxu1 %v2769_v22 }
  0xd7   : > { %1356 = vmatmul.mubr.bf16.gmra.mrb[68].mxu0 %v2771_v23  ;;  %1612 = vmatmul.mubr.bf16.gmra.mrb[68].mxu1 %v2772_v24 }
  0xd8   : > { %1363 = vmatprep.mubr.bf16.mxu0 %v2773_v25  ;;  %1619 = vmatprep.mubr.bf16.mxu1 %v2775_v26 }
  0xdf   : > { %1364 = vmatmul.mubr.bf16.gmra.mrb[72].mxu0 %v2777_v27  ;;  %1620 = vmatmul.mubr.bf16.gmra.mrb[72].mxu1 %v2778_v28 }
  0xe0   : > { %1371 = vmatprep.mubr.bf16.mxu0 %v2779_v29  ;;  %1627 = vmatprep.mubr.bf16.mxu1 %v2781_v30 }
  0xe7   : > { %1372 = vmatmul.mubr.bf16.gmra.mrb[76].mxu0 %v2783_v31  ;;  %1628 = vmatmul.mubr.bf16.gmra.mrb[76].mxu1 %v2784_v32  ;;  %v2837_v31 = vld [vmem:[%s3054_s26 + $0x1c0] ss:$8 sps:$4 sm:$0xff]  }
  0xe8   : > { %1379 = vmatprep.mubr.bf16.mxu0 %v2785_v33  ;;  %1635 = vmatprep.mubr.bf16.mxu1 %v2787_v34  ;;  %v2838_v32 = vld [vmem:[%s3054_s26 + $0x3c0] ss:$8 sps:$4 sm:$0xff]  }
  0xef   : > { %1380 = vmatmul.mubr.bf16.gmra.mrb[80].mxu0 %v2789_v35  ;;  %1636 = vmatmul.mubr.bf16.gmra.mrb[80].mxu1 %v2790_v36  ;;  %v2839_v35 = vld [vmem:[%s3054_s26 + $0x1d4] ss:$8 sps:$4 sm:$0xff]  }
  0xf0   : > { %1387 = vmatprep.mubr.bf16.mxu0 %v2791_v37  ;;  %1643 = vmatprep.mubr.bf16.mxu1 %v2793_v38  ;;  %v2841_v36 = vld [vmem:[%s3054_s26 + $0x3d4] ss:$8 sps:$4 sm:$0xff]  }
  0xf7   : > { %1388 = vmatmul.mubr.bf16.gmra.mrb[84].mxu0 %v2795_v39  ;;  %1644 = vmatmul.mubr.bf16.gmra.mrb[84].mxu1 %v2796_v40 }
  0xf8   : > { %1395 = vmatprep.mubr.bf16.mxu0 %v2797_v41  ;;  %1651 = vmatprep.mubr.bf16.mxu1 %v2799_v42 }
  0xff   : > { %1396 = vmatmul.mubr.bf16.gmra.mrb[88].mxu0 %v2801_v43  ;;  %1652 = vmatmul.mubr.bf16.gmra.mrb[88].mxu1 %v2802_v44 }
 0x100   : > { %1403 = vmatprep.mubr.bf16.mxu0 %v2803_v45  ;;  %1659 = vmatprep.mubr.bf16.mxu1 %v2805_v46 }
 0x107   : > { %1404 = vmatmul.mubr.bf16.gmra.mrb[92].mxu0 %v2807_v47  ;;  %1660 = vmatmul.mubr.bf16.gmra.mrb[92].mxu1 %v2808_v48 }
 0x108   : > { %1411 = vmatprep.mubr.bf16.mxu0 %v2809_v49  ;;  %1667 = vmatprep.mubr.bf16.mxu1 %v2811_v50 }
 0x10f   : > { %1412 = vmatmul.mubr.bf16.gmra.mrb[96].mxu0 %v2813_v51  ;;  %1668 = vmatmul.mubr.bf16.gmra.mrb[96].mxu1 %v2814_v52 }
 0x110   : > { %1419 = vmatprep.mubr.bf16.mxu0 %v2815_v53  ;;  %1675 = vmatprep.mubr.bf16.mxu1 %v2817_v54 }
 0x117   : > { %1420 = vmatmul.mubr.bf16.gmra.mrb[100].mxu0 %v2819_v55  ;;  %1676 = vmatmul.mubr.bf16.gmra.mrb[100].mxu1 %v2820_v56  ;;  %v2843_v55 = vld [vmem:[%s3054_s26 + $0x1d0] ss:$8 sps:$4 sm:$0xff]  }
 0x118   : > { %1427 = vmatprep.mubr.bf16.mxu0 %v2821_v57  ;;  %1683 = vmatprep.mubr.bf16.mxu1 %v2823_v58  ;;  %v2844_v56 = vld [vmem:[%s3054_s26 + $0x3d0] ss:$8 sps:$4 sm:$0xff]  }
 0x11f   : > { %1428 = vmatmul.mubr.bf16.gmra.mrb[104].mxu0 %v2825_v59  ;;  %1684 = vmatmul.mubr.bf16.gmra.mrb[104].mxu1 %v2826_v60  ;;  %v2845_v59 = vld [vmem:[%s3054_s26 + $0x1e4] ss:$8 sps:$4 sm:$0xff]  }
 0x120   : > { %1435 = vmatprep.mubr.bf16.mxu0 %v2827_v61  ;;  %1691 = vmatprep.mubr.bf16.mxu1 %v2829_v62  ;;  %v2847_v60 = vld [vmem:[%s3054_s26 + $0x3e4] ss:$8 sps:$4 sm:$0xff]  }
 0x122   : > { %v1221_v0 = vpop.f32.mrb[0].mxu0  ;;  %v1477_v2 = vpop.f32.mrb[0].mxu1 }
 0x123   : > { %v1739_v3 = vmul.f32 %v3227_v63, %v1221_v0  ;;  %v1803_v4 = vmul.f32 %v3227_v63, %v1477_v2  ;;  %v1223_v5 = vpop.f32.mrb[1].mxu0  ;;  %v1479_v6 = vpop.f32.mrb[1].mxu1 }
 0x124   : > { %v1224_v9 = vpop.f32.mrb[2].mxu0  ;;  %v1480_v10 = vpop.f32.mrb[2].mxu1 }
 0x125   : > { %v1874_v13 = vadd.f32 %v3234_v1, %v1739_v3  ;;  %v1938_v14 = vadd.f32 %v3234_v1, %v1803_v4  ;;  %v1740_v15 = vmul.f32 %v3227_v63, %v1224_v9  ;;  %v1804_v16 = vmul.f32 %v3227_v63, %v1480_v10  ;;  %v1226_v17 = vpop.f32.mrb[3].mxu0  ;;  %v1482_v18 = vpop.f32.mrb[3].mxu1 }
 0x126   : > { %v2849_v17 = vld [vmem:[%s3054_s26 + $0x1e0] ss:$8 sps:$4 sm:$0xff]  }
 0x127   : > { %v2002_v19 = vmax.f32 %v1874_v13, 0.0  ;;  %v2066_v20 = vmax.f32 %v1938_v14, 0.0  ;;  %v1875_v21 = vadd.f32 %v3234_v1, %v1740_v15  ;;  %v1939_v22 = vadd.f32 %v3234_v1, %v1804_v16  ;;  %1436 = vmatmul.mubr.bf16.gmra.mrb[108].mxu0 %v2831_v7  ;;  %1692 = vmatmul.mubr.bf16.gmra.mrb[108].mxu1 %v2832_v8  ;;  %v2850_v18 = vld [vmem:[%s3054_s26 + $0x3e0] ss:$8 sps:$4 sm:$0xff]  }
 0x128   : > { %1443 = vmatprep.mubr.bf16.mxu0 %v2833_v11  ;;  %1699 = vmatprep.mubr.bf16.mxu1 %v2835_v12 }
 0x129   : > { %2131 = vst.msk [vmem:[%s3248_s29] sm:$0xff] %vm2130_vm0, %v2002_v19  ;;  %2195 = vst.msk [vmem:[%s3248_s29 + $0x200] sm:$0xff] %vm2130_vm0, %v2066_v20  ;;  %v2003_v23 = vmax.f32 %v1875_v21, 0.0  ;;  %v2067_v24 = vmax.f32 %v1939_v22, 0.0  ;;  %v2851_v21 = vld [vmem:[%s3054_s26 + $0x1f4] ss:$8 sps:$4 sm:$0xff]  }
 0x12a   : > { %v1229_v25 = vpop.f32.mrb[4].mxu0  ;;  %v1485_v26 = vpop.f32.mrb[4].mxu1  ;;  %v2853_v22 = vld [vmem:[%s3054_s26 + $0x3f4] ss:$8 sps:$4 sm:$0xff]  }
 0x12b   : > { %2132 = vst.msk [vmem:[%s3248_s29 + $0x8] sm:$0xff] %vm2130_vm0, %v2003_v23  ;;  %2196 = vst.msk [vmem:[%s3248_s29 + $0x208] sm:$0xff] %vm2130_vm0, %v2067_v24  ;;  %v1741_v27 = vmul.f32 %v3227_v63, %v1229_v25  ;;  %v1805_v28 = vmul.f32 %v3227_v63, %v1485_v26  ;;  %v1231_v29 = vpop.f32.mrb[5].mxu0  ;;  %v1487_v30 = vpop.f32.mrb[5].mxu1 }
 0x12c   : > { %v1232_v33 = vpop.f32.mrb[6].mxu0  ;;  %v1488_v34 = vpop.f32.mrb[6].mxu1 }
 0x12d   : > { %v1876_v37 = vadd.f32 %v3234_v1, %v1741_v27  ;;  %v1940_v38 = vadd.f32 %v3234_v1, %v1805_v28  ;;  %v1742_v39 = vmul.f32 %v3227_v63, %v1232_v33  ;;  %v1806_v40 = vmul.f32 %v3227_v63, %v1488_v34  ;;  %v1234_v41 = vpop.f32.mrb[7].mxu0  ;;  %v1490_v42 = vpop.f32.mrb[7].mxu1 }
 0x12e   : > { %v2855_v41 = vld [vmem:[%s3054_s26 + $0x1f0] ss:$8 sps:$4 sm:$0xff]  }
 0x12f   : > { %v2004_v43 = vmax.f32 %v1876_v37, 0.0  ;;  %v2068_v44 = vmax.f32 %v1940_v38, 0.0  ;;  %v1877_v45 = vadd.f32 %v3234_v1, %v1742_v39  ;;  %v1941_v46 = vadd.f32 %v3234_v1, %v1806_v40  ;;  %1444 = vmatmul.mubr.bf16.gmra.mrb[112].mxu0 %v2837_v31  ;;  %1700 = vmatmul.mubr.bf16.gmra.mrb[112].mxu1 %v2838_v32  ;;  %v2856_v42 = vld [vmem:[%s3054_s26 + $0x3f0] ss:$8 sps:$4 sm:$0xff]  }
 0x130   : > { %1451 = vmatprep.mubr.bf16.mxu0 %v2839_v35  ;;  %1707 = vmatprep.mubr.bf16.mxu1 %v2841_v36 }
 0x131   : > { %2133 = vst.msk [vmem:[%s3248_s29 + $0x10] sm:$0xff] %vm2130_vm0, %v2004_v43  ;;  %2197 = vst.msk [vmem:[%s3248_s29 + $0x210] sm:$0xff] %vm2130_vm0, %v2068_v44  ;;  %v2005_v47 = vmax.f32 %v1877_v45, 0.0  ;;  %v2069_v48 = vmax.f32 %v1941_v46, 0.0 }
 0x132   : > { %v1237_v49 = vpop.f32.mrb[8].mxu0  ;;  %v1493_v50 = vpop.f32.mrb[8].mxu1 }
 0x133   : > { %2134 = vst.msk [vmem:[%s3248_s29 + $0x18] sm:$0xff] %vm2130_vm0, %v2005_v47  ;;  %2198 = vst.msk [vmem:[%s3248_s29 + $0x218] sm:$0xff] %vm2130_vm0, %v2069_v48  ;;  %v1743_v51 = vmul.f32 %v3227_v63, %v1237_v49  ;;  %v1807_v52 = vmul.f32 %v3227_v63, %v1493_v50  ;;  %v1239_v53 = vpop.f32.mrb[9].mxu0  ;;  %v1495_v54 = vpop.f32.mrb[9].mxu1 }
 0x134   : > { %v1240_v57 = vpop.f32.mrb[10].mxu0  ;;  %v1496_v58 = vpop.f32.mrb[10].mxu1 }
 0x135   : > { %v1878_v61 = vadd.f32 %v3234_v1, %v1743_v51  ;;  %v1942_v62 = vadd.f32 %v3234_v1, %v1807_v52  ;;  %v1744_v0 = vmul.f32 %v3227_v63, %v1240_v57  ;;  %v1808_v2 = vmul.f32 %v3227_v63, %v1496_v58  ;;  %v1242_v3 = vpop.f32.mrb[11].mxu0  ;;  %v1498_v4 = vpop.f32.mrb[11].mxu1 }
 0x137   : > { %v2006_v5 = vmax.f32 %v1878_v61, 0.0  ;;  %v2070_v6 = vmax.f32 %v1942_v62, 0.0  ;;  %v1879_v7 = vadd.f32 %v3234_v1, %v1744_v0  ;;  %v1943_v8 = vadd.f32 %v3234_v1, %v1808_v2  ;;  %1452 = vmatmul.mubr.bf16.gmra.mrb[116].mxu0 %v2843_v55  ;;  %1708 = vmatmul.mubr.bf16.gmra.mrb[116].mxu1 %v2844_v56 }
 0x138   : > { %1459 = vmatprep.mubr.bf16.mxu0 %v2845_v59  ;;  %1715 = vmatprep.mubr.bf16.mxu1 %v2847_v60 }
 0x139   : > { %2135 = vst.msk [vmem:[%s3248_s29 + $0x20] sm:$0xff] %vm2130_vm0, %v2006_v5  ;;  %2199 = vst.msk [vmem:[%s3248_s29 + $0x220] sm:$0xff] %vm2130_vm0, %v2070_v6  ;;  %v2007_v9 = vmax.f32 %v1879_v7, 0.0  ;;  %v2071_v10 = vmax.f32 %v1943_v8, 0.0 }
 0x13a   : > { %v1245_v11 = vpop.f32.mrb[12].mxu0  ;;  %v1501_v12 = vpop.f32.mrb[12].mxu1 }
 0x13b   : > { %2136 = vst.msk [vmem:[%s3248_s29 + $0x28] sm:$0xff] %vm2130_vm0, %v2007_v9  ;;  %2200 = vst.msk [vmem:[%s3248_s29 + $0x228] sm:$0xff] %vm2130_vm0, %v2071_v10  ;;  %v1745_v13 = vmul.f32 %v3227_v63, %v1245_v11  ;;  %v1809_v14 = vmul.f32 %v3227_v63, %v1501_v12  ;;  %v1247_v15 = vpop.f32.mrb[13].mxu0  ;;  %v1503_v16 = vpop.f32.mrb[13].mxu1 }
 0x13c   : > { %v1248_v19 = vpop.f32.mrb[14].mxu0  ;;  %v1504_v20 = vpop.f32.mrb[14].mxu1 }
 0x13d   : > { %v1880_v23 = vadd.f32 %v3234_v1, %v1745_v13  ;;  %v1944_v24 = vadd.f32 %v3234_v1, %v1809_v14  ;;  %v1746_v25 = vmul.f32 %v3227_v63, %v1248_v19  ;;  %v1810_v26 = vmul.f32 %v3227_v63, %v1504_v20  ;;  %v1250_v27 = vpop.f32.mrb[15].mxu0  ;;  %v1506_v28 = vpop.f32.mrb[15].mxu1 }
 0x13f   : > { %v2008_v29 = vmax.f32 %v1880_v23, 0.0  ;;  %v2072_v30 = vmax.f32 %v1944_v24, 0.0  ;;  %v1881_v31 = vadd.f32 %v3234_v1, %v1746_v25  ;;  %v1945_v32 = vadd.f32 %v3234_v1, %v1810_v26  ;;  %1460 = vmatmul.mubr.bf16.gmra.mrb[120].mxu0 %v2849_v17  ;;  %1716 = vmatmul.mubr.bf16.gmra.mrb[120].mxu1 %v2850_v18 }
 0x140   : > { %1467 = vmatprep.mubr.bf16.mxu0 %v2851_v21  ;;  %1723 = vmatprep.mubr.bf16.mxu1 %v2853_v22 }
 0x141   : > { %2137 = vst.msk [vmem:[%s3248_s29 + $0x30] sm:$0xff] %vm2130_vm0, %v2008_v29  ;;  %2201 = vst.msk [vmem:[%s3248_s29 + $0x230] sm:$0xff] %vm2130_vm0, %v2072_v30  ;;  %v2009_v33 = vmax.f32 %v1881_v31, 0.0  ;;  %v2073_v34 = vmax.f32 %v1945_v32, 0.0 }
 0x142   : > { %v1253_v35 = vpop.f32.mrb[16].mxu0  ;;  %v1509_v36 = vpop.f32.mrb[16].mxu1 }
 0x143   : > { %2138 = vst.msk [vmem:[%s3248_s29 + $0x38] sm:$0xff] %vm2130_vm0, %v2009_v33  ;;  %2202 = vst.msk [vmem:[%s3248_s29 + $0x238] sm:$0xff] %vm2130_vm0, %v2073_v34  ;;  %v1747_v37 = vmul.f32 %v3227_v63, %v1253_v35  ;;  %v1811_v38 = vmul.f32 %v3227_v63, %v1509_v36  ;;  %v1255_v39 = vpop.f32.mrb[17].mxu0  ;;  %v1511_v40 = vpop.f32.mrb[17].mxu1 }
 0x144   : > { %v1256_v43 = vpop.f32.mrb[18].mxu0  ;;  %v1512_v44 = vpop.f32.mrb[18].mxu1 }
 0x145   : > { %v1882_v45 = vadd.f32 %v3234_v1, %v1747_v37  ;;  %v1946_v46 = vadd.f32 %v3234_v1, %v1811_v38  ;;  %v1748_v47 = vmul.f32 %v3227_v63, %v1256_v43  ;;  %v1812_v48 = vmul.f32 %v3227_v63, %v1512_v44  ;;  %v1258_v49 = vpop.f32.mrb[19].mxu0  ;;  %v1514_v50 = vpop.f32.mrb[19].mxu1 }
 0x147   : > { %v2010_v51 = vmax.f32 %v1882_v45, 0.0  ;;  %v2074_v52 = vmax.f32 %v1946_v46, 0.0  ;;  %v1883_v53 = vadd.f32 %v3234_v1, %v1748_v47  ;;  %v1947_v54 = vadd.f32 %v3234_v1, %v1812_v48  ;;  %1468 = vmatmul.mubr.bf16.gmra.mrb[124].mxu0 %v2855_v41  ;;  %1724 = vmatmul.mubr.bf16.gmra.mrb[124].mxu1 %v2856_v42 }
 0x149   : > { %2139 = vst.msk [vmem:[%s3248_s29 + $0x40] sm:$0xff] %vm2130_vm0, %v2010_v51  ;;  %2203 = vst.msk [vmem:[%s3248_s29 + $0x240] sm:$0xff] %vm2130_vm0, %v2074_v52  ;;  %v2011_v55 = vmax.f32 %v1883_v53, 0.0  ;;  %v2075_v56 = vmax.f32 %v1947_v54, 0.0 }
 0x14a   : > { %v1261_v57 = vpop.f32.mrb[20].mxu0  ;;  %v1517_v58 = vpop.f32.mrb[20].mxu1 }
 0x14b   : > { %2140 = vst.msk [vmem:[%s3248_s29 + $0x48] sm:$0xff] %vm2130_vm0, %v2011_v55  ;;  %2204 = vst.msk [vmem:[%s3248_s29 + $0x248] sm:$0xff] %vm2130_vm0, %v2075_v56  ;;  %v1749_v59 = vmul.f32 %v3227_v63, %v1261_v57  ;;  %v1813_v60 = vmul.f32 %v3227_v63, %v1517_v58  ;;  %v1263_v61 = vpop.f32.mrb[21].mxu0  ;;  %v1519_v62 = vpop.f32.mrb[21].mxu1 }
 0x14c   : > { %v1264_v0 = vpop.f32.mrb[22].mxu0  ;;  %v1520_v2 = vpop.f32.mrb[22].mxu1 }
 0x14d   : > { %v1884_v3 = vadd.f32 %v3234_v1, %v1749_v59  ;;  %v1948_v4 = vadd.f32 %v3234_v1, %v1813_v60  ;;  %v1750_v5 = vmul.f32 %v3227_v63, %v1264_v0  ;;  %v1814_v6 = vmul.f32 %v3227_v63, %v1520_v2  ;;  %v1266_v7 = vpop.f32.mrb[23].mxu0  ;;  %v1522_v8 = vpop.f32.mrb[23].mxu1 }
 0x14f   : > { %v2012_v9 = vmax.f32 %v1884_v3, 0.0  ;;  %v2076_v10 = vmax.f32 %v1948_v4, 0.0  ;;  %v1885_v11 = vadd.f32 %v3234_v1, %v1750_v5  ;;  %v1949_v12 = vadd.f32 %v3234_v1, %v1814_v6 }
 0x151   : > { %2141 = vst.msk [vmem:[%s3248_s29 + $0x50] sm:$0xff] %vm2130_vm0, %v2012_v9  ;;  %2205 = vst.msk [vmem:[%s3248_s29 + $0x250] sm:$0xff] %vm2130_vm0, %v2076_v10  ;;  %v2013_v13 = vmax.f32 %v1885_v11, 0.0  ;;  %v2077_v14 = vmax.f32 %v1949_v12, 0.0 }
 0x152   : > { %v1269_v15 = vpop.f32.mrb[24].mxu0  ;;  %v1525_v16 = vpop.f32.mrb[24].mxu1 }
 0x153   : > { %2142 = vst.msk [vmem:[%s3248_s29 + $0x58] sm:$0xff] %vm2130_vm0, %v2013_v13  ;;  %2206 = vst.msk [vmem:[%s3248_s29 + $0x258] sm:$0xff] %vm2130_vm0, %v2077_v14  ;;  %v1751_v17 = vmul.f32 %v3227_v63, %v1269_v15  ;;  %v1815_v18 = vmul.f32 %v3227_v63, %v1525_v16  ;;  %v1271_v19 = vpop.f32.mrb[25].mxu0  ;;  %v1527_v20 = vpop.f32.mrb[25].mxu1 }
 0x154   : > { %v1272_v21 = vpop.f32.mrb[26].mxu0  ;;  %v1528_v22 = vpop.f32.mrb[26].mxu1 }
 0x155   : > { %v1886_v23 = vadd.f32 %v3234_v1, %v1751_v17  ;;  %v1950_v24 = vadd.f32 %v3234_v1, %v1815_v18  ;;  %v1752_v25 = vmul.f32 %v3227_v63, %v1272_v21  ;;  %v1816_v26 = vmul.f32 %v3227_v63, %v1528_v22  ;;  %v1274_v27 = vpop.f32.mrb[27].mxu0  ;;  %v1530_v28 = vpop.f32.mrb[27].mxu1 }
 0x157   : > { %v2014_v29 = vmax.f32 %v1886_v23, 0.0  ;;  %v2078_v30 = vmax.f32 %v1950_v24, 0.0  ;;  %v1887_v31 = vadd.f32 %v3234_v1, %v1752_v25  ;;  %v1951_v32 = vadd.f32 %v3234_v1, %v1816_v26 }
 0x159   : > { %2143 = vst.msk [vmem:[%s3248_s29 + $0x60] sm:$0xff] %vm2130_vm0, %v2014_v29  ;;  %2207 = vst.msk [vmem:[%s3248_s29 + $0x260] sm:$0xff] %vm2130_vm0, %v2078_v30  ;;  %v2015_v33 = vmax.f32 %v1887_v31, 0.0  ;;  %v2079_v34 = vmax.f32 %v1951_v32, 0.0 }
 0x15a   : > { %v1277_v35 = vpop.f32.mrb[28].mxu0  ;;  %v1533_v36 = vpop.f32.mrb[28].mxu1 }
 0x15b   : > { %2144 = vst.msk [vmem:[%s3248_s29 + $0x68] sm:$0xff] %vm2130_vm0, %v2015_v33  ;;  %2208 = vst.msk [vmem:[%s3248_s29 + $0x268] sm:$0xff] %vm2130_vm0, %v2079_v34  ;;  %v1753_v37 = vmul.f32 %v3227_v63, %v1277_v35  ;;  %v1817_v38 = vmul.f32 %v3227_v63, %v1533_v36  ;;  %v1279_v39 = vpop.f32.mrb[29].mxu0  ;;  %v1535_v40 = vpop.f32.mrb[29].mxu1 }
 0x15c   : > { %v1280_v41 = vpop.f32.mrb[30].mxu0  ;;  %v1536_v42 = vpop.f32.mrb[30].mxu1 }
 0x15d   : > { %v1888_v43 = vadd.f32 %v3234_v1, %v1753_v37  ;;  %v1952_v44 = vadd.f32 %v3234_v1, %v1817_v38  ;;  %v1754_v45 = vmul.f32 %v3227_v63, %v1280_v41  ;;  %v1818_v46 = vmul.f32 %v3227_v63, %v1536_v42  ;;  %v1282_v47 = vpop.f32.mrb[31].mxu0  ;;  %v1538_v48 = vpop.f32.mrb[31].mxu1 }
 0x15f   : > { %v2016_v49 = vmax.f32 %v1888_v43, 0.0  ;;  %v2080_v50 = vmax.f32 %v1952_v44, 0.0  ;;  %v1889_v51 = vadd.f32 %v3234_v1, %v1754_v45  ;;  %v1953_v52 = vadd.f32 %v3234_v1, %v1818_v46 }
 0x161   : > { %2145 = vst.msk [vmem:[%s3248_s29 + $0x70] sm:$0xff] %vm2130_vm0, %v2016_v49  ;;  %2209 = vst.msk [vmem:[%s3248_s29 + $0x270] sm:$0xff] %vm2130_vm0, %v2080_v50  ;;  %v2017_v53 = vmax.f32 %v1889_v51, 0.0  ;;  %v2081_v54 = vmax.f32 %v1953_v52, 0.0 }
 0x162   : > { %v1285_v55 = vpop.f32.mrb[32].mxu0  ;;  %v1541_v56 = vpop.f32.mrb[32].mxu1 }
 0x163   : > { %2146 = vst.msk [vmem:[%s3248_s29 + $0x78] sm:$0xff] %vm2130_vm0, %v2017_v53  ;;  %2210 = vst.msk [vmem:[%s3248_s29 + $0x278] sm:$0xff] %vm2130_vm0, %v2081_v54  ;;  %v1755_v57 = vmul.f32 %v3227_v63, %v1285_v55  ;;  %v1819_v58 = vmul.f32 %v3227_v63, %v1541_v56  ;;  %v1287_v59 = vpop.f32.mrb[33].mxu0  ;;  %v1543_v60 = vpop.f32.mrb[33].mxu1 }
 0x164   : > { %v1288_v61 = vpop.f32.mrb[34].mxu0  ;;  %v1544_v62 = vpop.f32.mrb[34].mxu1 }
 0x165   : > { %v1890_v0 = vadd.f32 %v3234_v1, %v1755_v57  ;;  %v1954_v2 = vadd.f32 %v3234_v1, %v1819_v58  ;;  %v1756_v3 = vmul.f32 %v3227_v63, %v1288_v61  ;;  %v1820_v4 = vmul.f32 %v3227_v63, %v1544_v62  ;;  %v1290_v5 = vpop.f32.mrb[35].mxu0  ;;  %v1546_v6 = vpop.f32.mrb[35].mxu1 }
 0x167   : > { %v2018_v7 = vmax.f32 %v1890_v0, 0.0  ;;  %v2082_v8 = vmax.f32 %v1954_v2, 0.0  ;;  %v1891_v9 = vadd.f32 %v3234_v1, %v1756_v3  ;;  %v1955_v10 = vadd.f32 %v3234_v1, %v1820_v4 }
 0x169   : > { %2147 = vst.msk [vmem:[%s3248_s29 + $0x80] sm:$0xff] %vm2130_vm0, %v2018_v7  ;;  %2211 = vst.msk [vmem:[%s3248_s29 + $0x280] sm:$0xff] %vm2130_vm0, %v2082_v8  ;;  %v2019_v11 = vmax.f32 %v1891_v9, 0.0  ;;  %v2083_v12 = vmax.f32 %v1955_v10, 0.0 }
 0x16a   : > { %v1293_v13 = vpop.f32.mrb[36].mxu0  ;;  %v1549_v14 = vpop.f32.mrb[36].mxu1 }
 0x16b   : > { %2148 = vst.msk [vmem:[%s3248_s29 + $0x88] sm:$0xff] %vm2130_vm0, %v2019_v11  ;;  %2212 = vst.msk [vmem:[%s3248_s29 + $0x288] sm:$0xff] %vm2130_vm0, %v2083_v12  ;;  %v1757_v15 = vmul.f32 %v3227_v63, %v1293_v13  ;;  %v1821_v16 = vmul.f32 %v3227_v63, %v1549_v14  ;;  %v1295_v17 = vpop.f32.mrb[37].mxu0  ;;  %v1551_v18 = vpop.f32.mrb[37].mxu1 }
 0x16c   : > { %v1296_v19 = vpop.f32.mrb[38].mxu0  ;;  %v1552_v20 = vpop.f32.mrb[38].mxu1 }
 0x16d   : > { %v1892_v21 = vadd.f32 %v3234_v1, %v1757_v15  ;;  %v1956_v22 = vadd.f32 %v3234_v1, %v1821_v16  ;;  %v1758_v23 = vmul.f32 %v3227_v63, %v1296_v19  ;;  %v1822_v24 = vmul.f32 %v3227_v63, %v1552_v20  ;;  %v1298_v25 = vpop.f32.mrb[39].mxu0  ;;  %v1554_v26 = vpop.f32.mrb[39].mxu1 }
 0x16f   : > { %v2020_v27 = vmax.f32 %v1892_v21, 0.0  ;;  %v2084_v28 = vmax.f32 %v1956_v22, 0.0  ;;  %v1893_v29 = vadd.f32 %v3234_v1, %v1758_v23  ;;  %v1957_v30 = vadd.f32 %v3234_v1, %v1822_v24 }
 0x171   : > { %2149 = vst.msk [vmem:[%s3248_s29 + $0x90] sm:$0xff] %vm2130_vm0, %v2020_v27  ;;  %2213 = vst.msk [vmem:[%s3248_s29 + $0x290] sm:$0xff] %vm2130_vm0, %v2084_v28  ;;  %v2021_v31 = vmax.f32 %v1893_v29, 0.0  ;;  %v2085_v32 = vmax.f32 %v1957_v30, 0.0 }
 0x172   : > { %v1301_v33 = vpop.f32.mrb[40].mxu0  ;;  %v1557_v34 = vpop.f32.mrb[40].mxu1 }
 0x173   : > { %2150 = vst.msk [vmem:[%s3248_s29 + $0x98] sm:$0xff] %vm2130_vm0, %v2021_v31  ;;  %2214 = vst.msk [vmem:[%s3248_s29 + $0x298] sm:$0xff] %vm2130_vm0, %v2085_v32  ;;  %v1759_v35 = vmul.f32 %v3227_v63, %v1301_v33  ;;  %v1823_v36 = vmul.f32 %v3227_v63, %v1557_v34  ;;  %v1303_v37 = vpop.f32.mrb[41].mxu0  ;;  %v1559_v38 = vpop.f32.mrb[41].mxu1 }
 0x174   : > { %v1304_v39 = vpop.f32.mrb[42].mxu0  ;;  %v1560_v40 = vpop.f32.mrb[42].mxu1 }
 0x175   : > { %v1894_v41 = vadd.f32 %v3234_v1, %v1759_v35  ;;  %v1958_v42 = vadd.f32 %v3234_v1, %v1823_v36  ;;  %v1760_v43 = vmul.f32 %v3227_v63, %v1304_v39  ;;  %v1824_v44 = vmul.f32 %v3227_v63, %v1560_v40  ;;  %v1306_v45 = vpop.f32.mrb[43].mxu0  ;;  %v1562_v46 = vpop.f32.mrb[43].mxu1 }
 0x177   : > { %v2022_v47 = vmax.f32 %v1894_v41, 0.0  ;;  %v2086_v48 = vmax.f32 %v1958_v42, 0.0  ;;  %v1895_v49 = vadd.f32 %v3234_v1, %v1760_v43  ;;  %v1959_v50 = vadd.f32 %v3234_v1, %v1824_v44 }
 0x179   : > { %2151 = vst.msk [vmem:[%s3248_s29 + $0xa0] sm:$0xff] %vm2130_vm0, %v2022_v47  ;;  %2215 = vst.msk [vmem:[%s3248_s29 + $0x2a0] sm:$0xff] %vm2130_vm0, %v2086_v48  ;;  %v2023_v51 = vmax.f32 %v1895_v49, 0.0  ;;  %v2087_v52 = vmax.f32 %v1959_v50, 0.0 }
 0x17a   : > { %v1309_v53 = vpop.f32.mrb[44].mxu0  ;;  %v1565_v54 = vpop.f32.mrb[44].mxu1 }
 0x17b   : > { %2152 = vst.msk [vmem:[%s3248_s29 + $0xa8] sm:$0xff] %vm2130_vm0, %v2023_v51  ;;  %2216 = vst.msk [vmem:[%s3248_s29 + $0x2a8] sm:$0xff] %vm2130_vm0, %v2087_v52  ;;  %v1761_v55 = vmul.f32 %v3227_v63, %v1309_v53  ;;  %v1825_v56 = vmul.f32 %v3227_v63, %v1565_v54  ;;  %v1311_v57 = vpop.f32.mrb[45].mxu0  ;;  %v1567_v58 = vpop.f32.mrb[45].mxu1 }
 0x17c   : > { %v1312_v59 = vpop.f32.mrb[46].mxu0  ;;  %v1568_v60 = vpop.f32.mrb[46].mxu1 }
 0x17d   : > { %v1896_v61 = vadd.f32 %v3234_v1, %v1761_v55  ;;  %v1960_v62 = vadd.f32 %v3234_v1, %v1825_v56  ;;  %v1762_v0 = vmul.f32 %v3227_v63, %v1312_v59  ;;  %v1826_v2 = vmul.f32 %v3227_v63, %v1568_v60  ;;  %v1314_v3 = vpop.f32.mrb[47].mxu0  ;;  %v1570_v4 = vpop.f32.mrb[47].mxu1 }
 0x17f   : > { %v2024_v5 = vmax.f32 %v1896_v61, 0.0  ;;  %v2088_v6 = vmax.f32 %v1960_v62, 0.0  ;;  %v1897_v7 = vadd.f32 %v3234_v1, %v1762_v0  ;;  %v1961_v8 = vadd.f32 %v3234_v1, %v1826_v2 }
 0x181   : > { %2153 = vst.msk [vmem:[%s3248_s29 + $0xb0] sm:$0xff] %vm2130_vm0, %v2024_v5  ;;  %2217 = vst.msk [vmem:[%s3248_s29 + $0x2b0] sm:$0xff] %vm2130_vm0, %v2088_v6  ;;  %v2025_v9 = vmax.f32 %v1897_v7, 0.0  ;;  %v2089_v10 = vmax.f32 %v1961_v8, 0.0 }
 0x182   : > { %v1317_v11 = vpop.f32.mrb[48].mxu0  ;;  %v1573_v12 = vpop.f32.mrb[48].mxu1 }
 0x183   : > { %2154 = vst.msk [vmem:[%s3248_s29 + $0xb8] sm:$0xff] %vm2130_vm0, %v2025_v9  ;;  %2218 = vst.msk [vmem:[%s3248_s29 + $0x2b8] sm:$0xff] %vm2130_vm0, %v2089_v10  ;;  %v1763_v13 = vmul.f32 %v3227_v63, %v1317_v11  ;;  %v1827_v14 = vmul.f32 %v3227_v63, %v1573_v12  ;;  %v1319_v15 = vpop.f32.mrb[49].mxu0  ;;  %v1575_v16 = vpop.f32.mrb[49].mxu1 }
 0x184   : > { %v1320_v17 = vpop.f32.mrb[50].mxu0  ;;  %v1576_v18 = vpop.f32.mrb[50].mxu1 }
 0x185   : > { %v1898_v19 = vadd.f32 %v3234_v1, %v1763_v13  ;;  %v1962_v20 = vadd.f32 %v3234_v1, %v1827_v14  ;;  %v1764_v21 = vmul.f32 %v3227_v63, %v1320_v17  ;;  %v1828_v22 = vmul.f32 %v3227_v63, %v1576_v18  ;;  %v1322_v23 = vpop.f32.mrb[51].mxu0  ;;  %v1578_v24 = vpop.f32.mrb[51].mxu1 }
 0x187   : > { %v2026_v25 = vmax.f32 %v1898_v19, 0.0  ;;  %v2090_v26 = vmax.f32 %v1962_v20, 0.0  ;;  %v1899_v27 = vadd.f32 %v3234_v1, %v1764_v21  ;;  %v1963_v28 = vadd.f32 %v3234_v1, %v1828_v22 }
 0x189   : > { %2155 = vst.msk [vmem:[%s3248_s29 + $0xc0] sm:$0xff] %vm2130_vm0, %v2026_v25  ;;  %2219 = vst.msk [vmem:[%s3248_s29 + $0x2c0] sm:$0xff] %vm2130_vm0, %v2090_v26  ;;  %v2027_v29 = vmax.f32 %v1899_v27, 0.0  ;;  %v2091_v30 = vmax.f32 %v1963_v28, 0.0 }
 0x18a   : > { %v1325_v31 = vpop.f32.mrb[52].mxu0  ;;  %v1581_v32 = vpop.f32.mrb[52].mxu1 }
 0x18b   : > { %2156 = vst.msk [vmem:[%s3248_s29 + $0xc8] sm:$0xff] %vm2130_vm0, %v2027_v29  ;;  %2220 = vst.msk [vmem:[%s3248_s29 + $0x2c8] sm:$0xff] %vm2130_vm0, %v2091_v30  ;;  %v1765_v33 = vmul.f32 %v3227_v63, %v1325_v31  ;;  %v1829_v34 = vmul.f32 %v3227_v63, %v1581_v32  ;;  %v1327_v35 = vpop.f32.mrb[53].mxu0  ;;  %v1583_v36 = vpop.f32.mrb[53].mxu1 }
 0x18c   : > { %v1328_v37 = vpop.f32.mrb[54].mxu0  ;;  %v1584_v38 = vpop.f32.mrb[54].mxu1 }
 0x18d   : > { %v1900_v39 = vadd.f32 %v3234_v1, %v1765_v33  ;;  %v1964_v40 = vadd.f32 %v3234_v1, %v1829_v34  ;;  %v1766_v41 = vmul.f32 %v3227_v63, %v1328_v37  ;;  %v1830_v42 = vmul.f32 %v3227_v63, %v1584_v38  ;;  %v1330_v43 = vpop.f32.mrb[55].mxu0  ;;  %v1586_v44 = vpop.f32.mrb[55].mxu1 }
 0x18f   : > { %v2028_v45 = vmax.f32 %v1900_v39, 0.0  ;;  %v2092_v46 = vmax.f32 %v1964_v40, 0.0  ;;  %v1901_v47 = vadd.f32 %v3234_v1, %v1766_v41  ;;  %v1965_v48 = vadd.f32 %v3234_v1, %v1830_v42 }
 0x191   : > { %2157 = vst.msk [vmem:[%s3248_s29 + $0xd0] sm:$0xff] %vm2130_vm0, %v2028_v45  ;;  %2221 = vst.msk [vmem:[%s3248_s29 + $0x2d0] sm:$0xff] %vm2130_vm0, %v2092_v46  ;;  %v2029_v49 = vmax.f32 %v1901_v47, 0.0  ;;  %v2093_v50 = vmax.f32 %v1965_v48, 0.0 }
 0x192   : > { %v1333_v51 = vpop.f32.mrb[56].mxu0  ;;  %v1589_v52 = vpop.f32.mrb[56].mxu1 }
 0x193   : > { %2158 = vst.msk [vmem:[%s3248_s29 + $0xd8] sm:$0xff] %vm2130_vm0, %v2029_v49  ;;  %2222 = vst.msk [vmem:[%s3248_s29 + $0x2d8] sm:$0xff] %vm2130_vm0, %v2093_v50  ;;  %v1767_v53 = vmul.f32 %v3227_v63, %v1333_v51  ;;  %v1831_v54 = vmul.f32 %v3227_v63, %v1589_v52  ;;  %v1335_v55 = vpop.f32.mrb[57].mxu0  ;;  %v1591_v56 = vpop.f32.mrb[57].mxu1 }
 0x194   : > { %v1336_v57 = vpop.f32.mrb[58].mxu0  ;;  %v1592_v58 = vpop.f32.mrb[58].mxu1 }
 0x195   : > { %v1902_v59 = vadd.f32 %v3234_v1, %v1767_v53  ;;  %v1966_v60 = vadd.f32 %v3234_v1, %v1831_v54  ;;  %v1768_v61 = vmul.f32 %v3227_v63, %v1336_v57  ;;  %v1832_v62 = vmul.f32 %v3227_v63, %v1592_v58  ;;  %v1338_v0 = vpop.f32.mrb[59].mxu0  ;;  %v1594_v2 = vpop.f32.mrb[59].mxu1 }
 0x197   : > { %v2030_v3 = vmax.f32 %v1902_v59, 0.0  ;;  %v2094_v4 = vmax.f32 %v1966_v60, 0.0  ;;  %v1903_v5 = vadd.f32 %v3234_v1, %v1768_v61  ;;  %v1967_v6 = vadd.f32 %v3234_v1, %v1832_v62 }
 0x199   : > { %2159 = vst.msk [vmem:[%s3248_s29 + $0xe0] sm:$0xff] %vm2130_vm0, %v2030_v3  ;;  %2223 = vst.msk [vmem:[%s3248_s29 + $0x2e0] sm:$0xff] %vm2130_vm0, %v2094_v4  ;;  %v2031_v7 = vmax.f32 %v1903_v5, 0.0  ;;  %v2095_v8 = vmax.f32 %v1967_v6, 0.0 }
 0x19a   : > { %v1341_v9 = vpop.f32.mrb[60].mxu0  ;;  %v1597_v10 = vpop.f32.mrb[60].mxu1 }
 0x19b   : > { %2160 = vst.msk [vmem:[%s3248_s29 + $0xe8] sm:$0xff] %vm2130_vm0, %v2031_v7  ;;  %2224 = vst.msk [vmem:[%s3248_s29 + $0x2e8] sm:$0xff] %vm2130_vm0, %v2095_v8  ;;  %v1769_v11 = vmul.f32 %v3227_v63, %v1341_v9  ;;  %v1833_v12 = vmul.f32 %v3227_v63, %v1597_v10  ;;  %v1343_v13 = vpop.f32.mrb[61].mxu0  ;;  %v1599_v14 = vpop.f32.mrb[61].mxu1 }
 0x19c   : > { %v1344_v15 = vpop.f32.mrb[62].mxu0  ;;  %v1600_v16 = vpop.f32.mrb[62].mxu1 }
 0x19d   : > { %v1904_v17 = vadd.f32 %v3234_v1, %v1769_v11  ;;  %v1968_v18 = vadd.f32 %v3234_v1, %v1833_v12  ;;  %v1770_v19 = vmul.f32 %v3227_v63, %v1344_v15  ;;  %v1834_v20 = vmul.f32 %v3227_v63, %v1600_v16  ;;  %v1346_v21 = vpop.f32.mrb[63].mxu0  ;;  %v1602_v22 = vpop.f32.mrb[63].mxu1 }
 0x19f   : > { %v2032_v23 = vmax.f32 %v1904_v17, 0.0  ;;  %v2096_v24 = vmax.f32 %v1968_v18, 0.0  ;;  %v1905_v25 = vadd.f32 %v3234_v1, %v1770_v19  ;;  %v1969_v26 = vadd.f32 %v3234_v1, %v1834_v20 }
 0x1a1   : > { %2161 = vst.msk [vmem:[%s3248_s29 + $0xf0] sm:$0xff] %vm2130_vm0, %v2032_v23  ;;  %2225 = vst.msk [vmem:[%s3248_s29 + $0x2f0] sm:$0xff] %vm2130_vm0, %v2096_v24  ;;  %v2033_v27 = vmax.f32 %v1905_v25, 0.0  ;;  %v2097_v28 = vmax.f32 %v1969_v26, 0.0 }
 0x1a2   : > { %v1349_v29 = vpop.f32.mrb[64].mxu0  ;;  %v1605_v30 = vpop.f32.mrb[64].mxu1 }
 0x1a3   : > { %2162 = vst.msk [vmem:[%s3248_s29 + $0xf8] sm:$0xff] %vm2130_vm0, %v2033_v27  ;;  %2226 = vst.msk [vmem:[%s3248_s29 + $0x2f8] sm:$0xff] %vm2130_vm0, %v2097_v28  ;;  %v1771_v31 = vmul.f32 %v3227_v63, %v1349_v29  ;;  %v1835_v32 = vmul.f32 %v3227_v63, %v1605_v30  ;;  %v1351_v33 = vpop.f32.mrb[65].mxu0  ;;  %v1607_v34 = vpop.f32.mrb[65].mxu1 }
 0x1a4   : > { %v1352_v35 = vpop.f32.mrb[66].mxu0  ;;  %v1608_v36 = vpop.f32.mrb[66].mxu1 }
 0x1a5   : > { %v1906_v37 = vadd.f32 %v3234_v1, %v1771_v31  ;;  %v1970_v38 = vadd.f32 %v3234_v1, %v1835_v32  ;;  %v1772_v39 = vmul.f32 %v3227_v63, %v1352_v35  ;;  %v1836_v40 = vmul.f32 %v3227_v63, %v1608_v36  ;;  %v1354_v41 = vpop.f32.mrb[67].mxu0  ;;  %v1610_v42 = vpop.f32.mrb[67].mxu1 }
 0x1a7   : > { %v2034_v43 = vmax.f32 %v1906_v37, 0.0  ;;  %v2098_v44 = vmax.f32 %v1970_v38, 0.0  ;;  %v1907_v45 = vadd.f32 %v3234_v1, %v1772_v39  ;;  %v1971_v46 = vadd.f32 %v3234_v1, %v1836_v40 }
 0x1a9   : > { %2163 = vst.msk [vmem:[%s3248_s29 + $0x100] sm:$0xff] %vm2130_vm0, %v2034_v43  ;;  %2227 = vst.msk [vmem:[%s3248_s29 + $0x300] sm:$0xff] %vm2130_vm0, %v2098_v44  ;;  %v2035_v47 = vmax.f32 %v1907_v45, 0.0  ;;  %v2099_v48 = vmax.f32 %v1971_v46, 0.0 }
 0x1aa   : > { %v1357_v49 = vpop.f32.mrb[68].mxu0  ;;  %v1613_v50 = vpop.f32.mrb[68].mxu1 }
 0x1ab   : > { %2164 = vst.msk [vmem:[%s3248_s29 + $0x108] sm:$0xff] %vm2130_vm0, %v2035_v47  ;;  %2228 = vst.msk [vmem:[%s3248_s29 + $0x308] sm:$0xff] %vm2130_vm0, %v2099_v48  ;;  %v1773_v51 = vmul.f32 %v3227_v63, %v1357_v49  ;;  %v1837_v52 = vmul.f32 %v3227_v63, %v1613_v50  ;;  %v1359_v53 = vpop.f32.mrb[69].mxu0  ;;  %v1615_v54 = vpop.f32.mrb[69].mxu1 }
 0x1ac   : > { %v1360_v55 = vpop.f32.mrb[70].mxu0  ;;  %v1616_v56 = vpop.f32.mrb[70].mxu1  ;;  %v3586_v54 = vld [vmem:[%s3849_s3] ss:$0 sm:$0xff] }
 0x1ad   : > { %v1908_v57 = vadd.f32 %v3234_v1, %v1773_v51  ;;  %v1972_v58 = vadd.f32 %v3234_v1, %v1837_v52  ;;  %v1774_v59 = vmul.f32 %v3227_v63, %v1360_v55  ;;  %v1838_v60 = vmul.f32 %v3227_v63, %v1616_v56  ;;  %v1362_v61 = vpop.f32.mrb[71].mxu0  ;;  %v1618_v62 = vpop.f32.mrb[71].mxu1 }
 0x1af   : > { %v2036_v0 = vmax.f32 %v1908_v57, 0.0  ;;  %v2100_v2 = vmax.f32 %v1972_v58, 0.0  ;;  %v1909_v3 = vadd.f32 %v3234_v1, %v1774_v59  ;;  %v1973_v4 = vadd.f32 %v3234_v1, %v1838_v60 }
 0x1b1   : > { %2165 = vst.msk [vmem:[%s3248_s29 + $0x110] sm:$0xff] %vm2130_vm0, %v2036_v0  ;;  %2229 = vst.msk [vmem:[%s3248_s29 + $0x310] sm:$0xff] %vm2130_vm0, %v2100_v2  ;;  %v2037_v5 = vmax.f32 %v1909_v3, 0.0  ;;  %v2101_v6 = vmax.f32 %v1973_v4, 0.0 }
 0x1b2   : > { %v1365_v7 = vpop.f32.mrb[72].mxu0  ;;  %v1621_v8 = vpop.f32.mrb[72].mxu1 }
 0x1b3   : > { %2166 = vst.msk [vmem:[%s3248_s29 + $0x118] sm:$0xff] %vm2130_vm0, %v2037_v5  ;;  %2230 = vst.msk [vmem:[%s3248_s29 + $0x318] sm:$0xff] %vm2130_vm0, %v2101_v6  ;;  %v1775_v9 = vmul.f32 %v3227_v63, %v1365_v7  ;;  %v1839_v10 = vmul.f32 %v3227_v63, %v1621_v8  ;;  %v1367_v11 = vpop.f32.mrb[73].mxu0  ;;  %v1623_v12 = vpop.f32.mrb[73].mxu1 }
 0x1b4   : > { %v1368_v13 = vpop.f32.mrb[74].mxu0  ;;  %v1624_v14 = vpop.f32.mrb[74].mxu1 }
 0x1b5   : > { %v1910_v15 = vadd.f32 %v3234_v1, %v1775_v9  ;;  %v1974_v16 = vadd.f32 %v3234_v1, %v1839_v10  ;;  %v1776_v17 = vmul.f32 %v3227_v63, %v1368_v13  ;;  %v1840_v18 = vmul.f32 %v3227_v63, %v1624_v14  ;;  %v1370_v19 = vpop.f32.mrb[75].mxu0  ;;  %v1626_v20 = vpop.f32.mrb[75].mxu1 }
 0x1b7   : > { %v2038_v21 = vmax.f32 %v1910_v15, 0.0  ;;  %v2102_v22 = vmax.f32 %v1974_v16, 0.0  ;;  %v1911_v23 = vadd.f32 %v3234_v1, %v1776_v17  ;;  %v1975_v24 = vadd.f32 %v3234_v1, %v1840_v18 }
 0x1b9   : > { %2167 = vst.msk [vmem:[%s3248_s29 + $0x120] sm:$0xff] %vm2130_vm0, %v2038_v21  ;;  %2231 = vst.msk [vmem:[%s3248_s29 + $0x320] sm:$0xff] %vm2130_vm0, %v2102_v22  ;;  %v2039_v25 = vmax.f32 %v1911_v23, 0.0  ;;  %v2103_v26 = vmax.f32 %v1975_v24, 0.0 }
 0x1ba   : > { %v1373_v27 = vpop.f32.mrb[76].mxu0  ;;  %v1629_v28 = vpop.f32.mrb[76].mxu1 }
 0x1bb   : > { %2168 = vst.msk [vmem:[%s3248_s29 + $0x128] sm:$0xff] %vm2130_vm0, %v2039_v25  ;;  %2232 = vst.msk [vmem:[%s3248_s29 + $0x328] sm:$0xff] %vm2130_vm0, %v2103_v26  ;;  %v1777_v29 = vmul.f32 %v3227_v63, %v1373_v27  ;;  %v1841_v30 = vmul.f32 %v3227_v63, %v1629_v28  ;;  %v1375_v31 = vpop.f32.mrb[77].mxu0  ;;  %v1631_v32 = vpop.f32.mrb[77].mxu1 }
 0x1bc   : > { %v1376_v33 = vpop.f32.mrb[78].mxu0  ;;  %v1632_v34 = vpop.f32.mrb[78].mxu1 }
 0x1bd   : > { %v1912_v35 = vadd.f32 %v3234_v1, %v1777_v29  ;;  %v1976_v36 = vadd.f32 %v3234_v1, %v1841_v30  ;;  %v1778_v37 = vmul.f32 %v3227_v63, %v1376_v33  ;;  %v1842_v38 = vmul.f32 %v3227_v63, %v1632_v34  ;;  %v1378_v39 = vpop.f32.mrb[79].mxu0  ;;  %v1634_v40 = vpop.f32.mrb[79].mxu1  ;;  %v3579_v63 = vld [vmem:[%s3848_s2] ss:$0 sm:$0xff] }
 0x1bf   : > { %v2040_v41 = vmax.f32 %v1912_v35, 0.0  ;;  %v2104_v42 = vmax.f32 %v1976_v36, 0.0  ;;  %v1913_v43 = vadd.f32 %v3234_v1, %v1778_v37  ;;  %v1977_v44 = vadd.f32 %v3234_v1, %v1842_v38 }
 0x1c1   : > { %2169 = vst.msk [vmem:[%s3248_s29 + $0x130] sm:$0xff] %vm2130_vm0, %v2040_v41  ;;  %2233 = vst.msk [vmem:[%s3248_s29 + $0x330] sm:$0xff] %vm2130_vm0, %v2104_v42  ;;  %v2041_v45 = vmax.f32 %v1913_v43, 0.0  ;;  %v2105_v46 = vmax.f32 %v1977_v44, 0.0 }
 0x1c2   : > { %v1381_v47 = vpop.f32.mrb[80].mxu0  ;;  %v1637_v48 = vpop.f32.mrb[80].mxu1 }
 0x1c3   : > { %2170 = vst.msk [vmem:[%s3248_s29 + $0x138] sm:$0xff] %vm2130_vm0, %v2041_v45  ;;  %2234 = vst.msk [vmem:[%s3248_s29 + $0x338] sm:$0xff] %vm2130_vm0, %v2105_v46  ;;  %v1779_v49 = vmul.f32 %v3579_v63, %v1381_v47  ;;  %v1843_v1 = vmul.f32 %v3579_v63, %v1637_v48  ;;  %v1383_v50 = vpop.f32.mrb[81].mxu0  ;;  %v1639_v51 = vpop.f32.mrb[81].mxu1 }
 0x1c4   : > { %v1384_v52 = vpop.f32.mrb[82].mxu0  ;;  %v1640_v53 = vpop.f32.mrb[82].mxu1 }
 0x1c5   : > { %v1914_v55 = vadd.f32 %v3586_v54, %v1779_v49  ;;  %v1978_v56 = vadd.f32 %v3586_v54, %v1843_v1  ;;  %v1780_v57 = vmul.f32 %v3579_v63, %v1384_v52  ;;  %v1844_v58 = vmul.f32 %v3579_v63, %v1640_v53  ;;  %v1386_v59 = vpop.f32.mrb[83].mxu0  ;;  %v1642_v60 = vpop.f32.mrb[83].mxu1 }
 0x1c7   : > { %v2042_v61 = vmax.f32 %v1914_v55, 0.0  ;;  %v2106_v62 = vmax.f32 %v1978_v56, 0.0  ;;  %v1915_v0 = vadd.f32 %v3586_v54, %v1780_v57  ;;  %v1979_v2 = vadd.f32 %v3586_v54, %v1844_v58 }
 0x1c9   : > { %2171 = vst.msk [vmem:[%s3248_s29 + $0x140] sm:$0xff] %vm2130_vm0, %v2042_v61  ;;  %2235 = vst.msk [vmem:[%s3248_s29 + $0x340] sm:$0xff] %vm2130_vm0, %v2106_v62  ;;  %v2043_v3 = vmax.f32 %v1915_v0, 0.0  ;;  %v2107_v4 = vmax.f32 %v1979_v2, 0.0 }
 0x1ca   : > { %v1389_v5 = vpop.f32.mrb[84].mxu0  ;;  %v1645_v6 = vpop.f32.mrb[84].mxu1 }
 0x1cb   : > { %2172 = vst.msk [vmem:[%s3248_s29 + $0x148] sm:$0xff] %vm2130_vm0, %v2043_v3  ;;  %2236 = vst.msk [vmem:[%s3248_s29 + $0x348] sm:$0xff] %vm2130_vm0, %v2107_v4  ;;  %v1781_v7 = vmul.f32 %v3579_v63, %v1389_v5  ;;  %v1845_v8 = vmul.f32 %v3579_v63, %v1645_v6  ;;  %v1391_v9 = vpop.f32.mrb[85].mxu0  ;;  %v1647_v10 = vpop.f32.mrb[85].mxu1 }
 0x1cc   : > { %v1392_v11 = vpop.f32.mrb[86].mxu0  ;;  %v1648_v12 = vpop.f32.mrb[86].mxu1 }
 0x1cd   : > { %v1916_v13 = vadd.f32 %v3586_v54, %v1781_v7  ;;  %v1980_v14 = vadd.f32 %v3586_v54, %v1845_v8  ;;  %v1782_v15 = vmul.f32 %v3579_v63, %v1392_v11  ;;  %v1846_v16 = vmul.f32 %v3579_v63, %v1648_v12  ;;  %v1394_v17 = vpop.f32.mrb[87].mxu0  ;;  %v1650_v18 = vpop.f32.mrb[87].mxu1 }
 0x1cf   : > { %v2044_v19 = vmax.f32 %v1916_v13, 0.0  ;;  %v2108_v20 = vmax.f32 %v1980_v14, 0.0  ;;  %v1917_v21 = vadd.f32 %v3586_v54, %v1782_v15  ;;  %v1981_v22 = vadd.f32 %v3586_v54, %v1846_v16 }
 0x1d1   : > { %2173 = vst.msk [vmem:[%s3248_s29 + $0x150] sm:$0xff] %vm2130_vm0, %v2044_v19  ;;  %2237 = vst.msk [vmem:[%s3248_s29 + $0x350] sm:$0xff] %vm2130_vm0, %v2108_v20  ;;  %v2045_v23 = vmax.f32 %v1917_v21, 0.0  ;;  %v2109_v24 = vmax.f32 %v1981_v22, 0.0 }
 0x1d2   : > { %v1397_v25 = vpop.f32.mrb[88].mxu0  ;;  %v1653_v26 = vpop.f32.mrb[88].mxu1 }
 0x1d3   : > { %2174 = vst.msk [vmem:[%s3248_s29 + $0x158] sm:$0xff] %vm2130_vm0, %v2045_v23  ;;  %2238 = vst.msk [vmem:[%s3248_s29 + $0x358] sm:$0xff] %vm2130_vm0, %v2109_v24  ;;  %v1783_v27 = vmul.f32 %v3579_v63, %v1397_v25  ;;  %v1847_v28 = vmul.f32 %v3579_v63, %v1653_v26  ;;  %v1399_v29 = vpop.f32.mrb[89].mxu0  ;;  %v1655_v30 = vpop.f32.mrb[89].mxu1 }
 0x1d4   : > { %v1400_v31 = vpop.f32.mrb[90].mxu0  ;;  %v1656_v32 = vpop.f32.mrb[90].mxu1 }
 0x1d5   : > { %v1918_v33 = vadd.f32 %v3586_v54, %v1783_v27  ;;  %v1982_v34 = vadd.f32 %v3586_v54, %v1847_v28  ;;  %v1784_v35 = vmul.f32 %v3579_v63, %v1400_v31  ;;  %v1848_v36 = vmul.f32 %v3579_v63, %v1656_v32  ;;  %v1402_v37 = vpop.f32.mrb[91].mxu0  ;;  %v1658_v38 = vpop.f32.mrb[91].mxu1 }
 0x1d7   : > { %v2046_v39 = vmax.f32 %v1918_v33, 0.0  ;;  %v2110_v40 = vmax.f32 %v1982_v34, 0.0  ;;  %v1919_v41 = vadd.f32 %v3586_v54, %v1784_v35  ;;  %v1983_v42 = vadd.f32 %v3586_v54, %v1848_v36 }
 0x1d9   : > { %2175 = vst.msk [vmem:[%s3248_s29 + $0x160] sm:$0xff] %vm2130_vm0, %v2046_v39  ;;  %2239 = vst.msk [vmem:[%s3248_s29 + $0x360] sm:$0xff] %vm2130_vm0, %v2110_v40  ;;  %v2047_v43 = vmax.f32 %v1919_v41, 0.0  ;;  %v2111_v44 = vmax.f32 %v1983_v42, 0.0 }
 0x1da   : > { %v1405_v45 = vpop.f32.mrb[92].mxu0  ;;  %v1661_v46 = vpop.f32.mrb[92].mxu1 }
 0x1db   : > { %2176 = vst.msk [vmem:[%s3248_s29 + $0x168] sm:$0xff] %vm2130_vm0, %v2047_v43  ;;  %2240 = vst.msk [vmem:[%s3248_s29 + $0x368] sm:$0xff] %vm2130_vm0, %v2111_v44  ;;  %v1785_v47 = vmul.f32 %v3579_v63, %v1405_v45  ;;  %v1849_v48 = vmul.f32 %v3579_v63, %v1661_v46  ;;  %v1407_v49 = vpop.f32.mrb[93].mxu0  ;;  %v1663_v1 = vpop.f32.mrb[93].mxu1 }
 0x1dc   : > { %v1408_v50 = vpop.f32.mrb[94].mxu0  ;;  %v1664_v51 = vpop.f32.mrb[94].mxu1 }
 0x1dd   : > { %v1920_v52 = vadd.f32 %v3586_v54, %v1785_v47  ;;  %v1984_v53 = vadd.f32 %v3586_v54, %v1849_v48  ;;  %v1786_v55 = vmul.f32 %v3579_v63, %v1408_v50  ;;  %v1850_v56 = vmul.f32 %v3579_v63, %v1664_v51  ;;  %v1410_v57 = vpop.f32.mrb[95].mxu0  ;;  %v1666_v58 = vpop.f32.mrb[95].mxu1 }
 0x1df   : > { %v2048_v59 = vmax.f32 %v1920_v52, 0.0  ;;  %v2112_v60 = vmax.f32 %v1984_v53, 0.0  ;;  %v1921_v61 = vadd.f32 %v3586_v54, %v1786_v55  ;;  %v1985_v62 = vadd.f32 %v3586_v54, %v1850_v56 }
 0x1e1   : > { %2177 = vst.msk [vmem:[%s3248_s29 + $0x170] sm:$0xff] %vm2130_vm0, %v2048_v59  ;;  %2241 = vst.msk [vmem:[%s3248_s29 + $0x370] sm:$0xff] %vm2130_vm0, %v2112_v60  ;;  %v2049_v0 = vmax.f32 %v1921_v61, 0.0  ;;  %v2113_v2 = vmax.f32 %v1985_v62, 0.0 }
 0x1e2   : > { %v1413_v3 = vpop.f32.mrb[96].mxu0  ;;  %v1669_v4 = vpop.f32.mrb[96].mxu1 }
 0x1e3   : > { %2178 = vst.msk [vmem:[%s3248_s29 + $0x178] sm:$0xff] %vm2130_vm0, %v2049_v0  ;;  %2242 = vst.msk [vmem:[%s3248_s29 + $0x378] sm:$0xff] %vm2130_vm0, %v2113_v2  ;;  %v1787_v5 = vmul.f32 %v3579_v63, %v1413_v3  ;;  %v1851_v6 = vmul.f32 %v3579_v63, %v1669_v4  ;;  %v1415_v7 = vpop.f32.mrb[97].mxu0  ;;  %v1671_v8 = vpop.f32.mrb[97].mxu1 }
 0x1e4   : > { %v1416_v9 = vpop.f32.mrb[98].mxu0  ;;  %v1672_v10 = vpop.f32.mrb[98].mxu1 }
 0x1e5   : > { %v1922_v11 = vadd.f32 %v3586_v54, %v1787_v5  ;;  %v1986_v12 = vadd.f32 %v3586_v54, %v1851_v6  ;;  %v1788_v13 = vmul.f32 %v3579_v63, %v1416_v9  ;;  %v1852_v14 = vmul.f32 %v3579_v63, %v1672_v10  ;;  %v1418_v15 = vpop.f32.mrb[99].mxu0  ;;  %v1674_v16 = vpop.f32.mrb[99].mxu1 }
 0x1e7   : > { %v2050_v17 = vmax.f32 %v1922_v11, 0.0  ;;  %v2114_v18 = vmax.f32 %v1986_v12, 0.0  ;;  %v1923_v19 = vadd.f32 %v3586_v54, %v1788_v13  ;;  %v1987_v20 = vadd.f32 %v3586_v54, %v1852_v14 }
 0x1e9   : > { %2179 = vst.msk [vmem:[%s3248_s29 + $0x180] sm:$0xff] %vm2130_vm0, %v2050_v17  ;;  %2243 = vst.msk [vmem:[%s3248_s29 + $0x380] sm:$0xff] %vm2130_vm0, %v2114_v18  ;;  %v2051_v21 = vmax.f32 %v1923_v19, 0.0  ;;  %v2115_v22 = vmax.f32 %v1987_v20, 0.0 }
 0x1ea   : > { %v1421_v23 = vpop.f32.mrb[100].mxu0  ;;  %v1677_v24 = vpop.f32.mrb[100].mxu1 }
 0x1eb   : > { %2180 = vst.msk [vmem:[%s3248_s29 + $0x188] sm:$0xff] %vm2130_vm0, %v2051_v21  ;;  %2244 = vst.msk [vmem:[%s3248_s29 + $0x388] sm:$0xff] %vm2130_vm0, %v2115_v22  ;;  %v1789_v25 = vmul.f32 %v3579_v63, %v1421_v23  ;;  %v1853_v26 = vmul.f32 %v3579_v63, %v1677_v24  ;;  %v1423_v27 = vpop.f32.mrb[101].mxu0  ;;  %v1679_v28 = vpop.f32.mrb[101].mxu1 }
 0x1ec   : > { %v1424_v29 = vpop.f32.mrb[102].mxu0  ;;  %v1680_v30 = vpop.f32.mrb[102].mxu1 }
 0x1ed   : > { %v1924_v31 = vadd.f32 %v3586_v54, %v1789_v25  ;;  %v1988_v32 = vadd.f32 %v3586_v54, %v1853_v26  ;;  %v1790_v33 = vmul.f32 %v3579_v63, %v1424_v29  ;;  %v1854_v34 = vmul.f32 %v3579_v63, %v1680_v30  ;;  %v1426_v35 = vpop.f32.mrb[103].mxu0  ;;  %v1682_v36 = vpop.f32.mrb[103].mxu1 }
 0x1ef   : > { %v2052_v37 = vmax.f32 %v1924_v31, 0.0  ;;  %v2116_v38 = vmax.f32 %v1988_v32, 0.0  ;;  %v1925_v39 = vadd.f32 %v3586_v54, %v1790_v33  ;;  %v1989_v40 = vadd.f32 %v3586_v54, %v1854_v34 }
 0x1f1   : > { %2181 = vst.msk [vmem:[%s3248_s29 + $0x190] sm:$0xff] %vm2130_vm0, %v2052_v37  ;;  %2245 = vst.msk [vmem:[%s3248_s29 + $0x390] sm:$0xff] %vm2130_vm0, %v2116_v38  ;;  %v2053_v41 = vmax.f32 %v1925_v39, 0.0  ;;  %v2117_v42 = vmax.f32 %v1989_v40, 0.0 }
 0x1f2   : > { %v1429_v43 = vpop.f32.mrb[104].mxu0  ;;  %v1685_v44 = vpop.f32.mrb[104].mxu1 }
 0x1f3   : > { %2182 = vst.msk [vmem:[%s3248_s29 + $0x198] sm:$0xff] %vm2130_vm0, %v2053_v41  ;;  %2246 = vst.msk [vmem:[%s3248_s29 + $0x398] sm:$0xff] %vm2130_vm0, %v2117_v42  ;;  %v1791_v45 = vmul.f32 %v3579_v63, %v1429_v43  ;;  %v1855_v46 = vmul.f32 %v3579_v63, %v1685_v44  ;;  %v1431_v47 = vpop.f32.mrb[105].mxu0  ;;  %v1687_v48 = vpop.f32.mrb[105].mxu1 }
 0x1f4   : > { %v1432_v49 = vpop.f32.mrb[106].mxu0  ;;  %v1688_v1 = vpop.f32.mrb[106].mxu1 }
 0x1f5   : > { %v1926_v50 = vadd.f32 %v3586_v54, %v1791_v45  ;;  %v1990_v51 = vadd.f32 %v3586_v54, %v1855_v46  ;;  %v1792_v52 = vmul.f32 %v3579_v63, %v1432_v49  ;;  %v1856_v53 = vmul.f32 %v3579_v63, %v1688_v1  ;;  %v1434_v55 = vpop.f32.mrb[107].mxu0  ;;  %v1690_v56 = vpop.f32.mrb[107].mxu1 }
 0x1f7   : > { %v2054_v57 = vmax.f32 %v1926_v50, 0.0  ;;  %v2118_v58 = vmax.f32 %v1990_v51, 0.0  ;;  %v1927_v59 = vadd.f32 %v3586_v54, %v1792_v52  ;;  %v1991_v60 = vadd.f32 %v3586_v54, %v1856_v53 }
 0x1f9   : > { %2183 = vst.msk [vmem:[%s3248_s29 + $0x1a0] sm:$0xff] %vm2130_vm0, %v2054_v57  ;;  %2247 = vst.msk [vmem:[%s3248_s29 + $0x3a0] sm:$0xff] %vm2130_vm0, %v2118_v58  ;;  %v2055_v61 = vmax.f32 %v1927_v59, 0.0  ;;  %v2119_v62 = vmax.f32 %v1991_v60, 0.0 }
 0x1fa   : > { %v1437_v0 = vpop.f32.mrb[108].mxu0  ;;  %v1693_v2 = vpop.f32.mrb[108].mxu1 }
 0x1fb   : > { %2184 = vst.msk [vmem:[%s3248_s29 + $0x1a8] sm:$0xff] %vm2130_vm0, %v2055_v61  ;;  %2248 = vst.msk [vmem:[%s3248_s29 + $0x3a8] sm:$0xff] %vm2130_vm0, %v2119_v62  ;;  %v1793_v3 = vmul.f32 %v3579_v63, %v1437_v0  ;;  %v1857_v4 = vmul.f32 %v3579_v63, %v1693_v2  ;;  %v1439_v5 = vpop.f32.mrb[109].mxu0  ;;  %v1695_v6 = vpop.f32.mrb[109].mxu1 }
 0x1fc   : > { %v1440_v7 = vpop.f32.mrb[110].mxu0  ;;  %v1696_v8 = vpop.f32.mrb[110].mxu1 }
 0x1fd   : > { %v1928_v9 = vadd.f32 %v3586_v54, %v1793_v3  ;;  %v1992_v10 = vadd.f32 %v3586_v54, %v1857_v4  ;;  %v1794_v11 = vmul.f32 %v3579_v63, %v1440_v7  ;;  %v1858_v12 = vmul.f32 %v3579_v63, %v1696_v8  ;;  %v1442_v13 = vpop.f32.mrb[111].mxu0  ;;  %v1698_v14 = vpop.f32.mrb[111].mxu1 }
 0x1ff   : > { %v2056_v15 = vmax.f32 %v1928_v9, 0.0  ;;  %v2120_v16 = vmax.f32 %v1992_v10, 0.0  ;;  %v1929_v17 = vadd.f32 %v3586_v54, %v1794_v11  ;;  %v1993_v18 = vadd.f32 %v3586_v54, %v1858_v12 }
 0x201   : > { %2185 = vst.msk [vmem:[%s3248_s29 + $0x1b0] sm:$0xff] %vm2130_vm0, %v2056_v15  ;;  %2249 = vst.msk [vmem:[%s3248_s29 + $0x3b0] sm:$0xff] %vm2130_vm0, %v2120_v16  ;;  %v2057_v19 = vmax.f32 %v1929_v17, 0.0  ;;  %v2121_v20 = vmax.f32 %v1993_v18, 0.0 }
 0x202   : > { %v1445_v21 = vpop.f32.mrb[112].mxu0  ;;  %v1701_v22 = vpop.f32.mrb[112].mxu1 }
 0x203   : > { %2186 = vst.msk [vmem:[%s3248_s29 + $0x1b8] sm:$0xff] %vm2130_vm0, %v2057_v19  ;;  %2250 = vst.msk [vmem:[%s3248_s29 + $0x3b8] sm:$0xff] %vm2130_vm0, %v2121_v20  ;;  %v1795_v23 = vmul.f32 %v3579_v63, %v1445_v21  ;;  %v1859_v24 = vmul.f32 %v3579_v63, %v1701_v22  ;;  %v1447_v25 = vpop.f32.mrb[113].mxu0  ;;  %v1703_v26 = vpop.f32.mrb[113].mxu1 }
 0x204   : > { %v1448_v27 = vpop.f32.mrb[114].mxu0  ;;  %v1704_v28 = vpop.f32.mrb[114].mxu1 }
 0x205   : > { %v1930_v29 = vadd.f32 %v3586_v54, %v1795_v23  ;;  %v1994_v30 = vadd.f32 %v3586_v54, %v1859_v24  ;;  %v1796_v31 = vmul.f32 %v3579_v63, %v1448_v27  ;;  %v1860_v32 = vmul.f32 %v3579_v63, %v1704_v28  ;;  %v1450_v33 = vpop.f32.mrb[115].mxu0  ;;  %v1706_v34 = vpop.f32.mrb[115].mxu1 }
 0x207   : > { %v2058_v35 = vmax.f32 %v1930_v29, 0.0  ;;  %v2122_v36 = vmax.f32 %v1994_v30, 0.0  ;;  %v1931_v37 = vadd.f32 %v3586_v54, %v1796_v31  ;;  %v1995_v38 = vadd.f32 %v3586_v54, %v1860_v32 }
 0x209   : > { %2187 = vst.msk [vmem:[%s3248_s29 + $0x1c0] sm:$0xff] %vm2130_vm0, %v2058_v35  ;;  %2251 = vst.msk [vmem:[%s3248_s29 + $0x3c0] sm:$0xff] %vm2130_vm0, %v2122_v36  ;;  %v2059_v39 = vmax.f32 %v1931_v37, 0.0  ;;  %v2123_v40 = vmax.f32 %v1995_v38, 0.0 }
 0x20a   : > { %v1453_v41 = vpop.f32.mrb[116].mxu0  ;;  %v1709_v42 = vpop.f32.mrb[116].mxu1 }
 0x20b   : > { %2188 = vst.msk [vmem:[%s3248_s29 + $0x1c8] sm:$0xff] %vm2130_vm0, %v2059_v39  ;;  %2252 = vst.msk [vmem:[%s3248_s29 + $0x3c8] sm:$0xff] %vm2130_vm0, %v2123_v40  ;;  %v1797_v43 = vmul.f32 %v3579_v63, %v1453_v41  ;;  %v1861_v44 = vmul.f32 %v3579_v63, %v1709_v42  ;;  %v1455_v45 = vpop.f32.mrb[117].mxu0  ;;  %v1711_v46 = vpop.f32.mrb[117].mxu1 }
 0x20c   : > { %v1456_v47 = vpop.f32.mrb[118].mxu0  ;;  %v1712_v48 = vpop.f32.mrb[118].mxu1 }
 0x20d   : > { %v1932_v49 = vadd.f32 %v3586_v54, %v1797_v43  ;;  %v1996_v1 = vadd.f32 %v3586_v54, %v1861_v44  ;;  %v1798_v50 = vmul.f32 %v3579_v63, %v1456_v47  ;;  %v1862_v51 = vmul.f32 %v3579_v63, %v1712_v48  ;;  %v1458_v52 = vpop.f32.mrb[119].mxu0  ;;  %v1714_v53 = vpop.f32.mrb[119].mxu1 }
 0x20f   : > { %v2060_v55 = vmax.f32 %v1932_v49, 0.0  ;;  %v2124_v56 = vmax.f32 %v1996_v1, 0.0  ;;  %v1933_v57 = vadd.f32 %v3586_v54, %v1798_v50  ;;  %v1997_v58 = vadd.f32 %v3586_v54, %v1862_v51 }
 0x211   : > { %2189 = vst.msk [vmem:[%s3248_s29 + $0x1d0] sm:$0xff] %vm2130_vm0, %v2060_v55  ;;  %2253 = vst.msk [vmem:[%s3248_s29 + $0x3d0] sm:$0xff] %vm2130_vm0, %v2124_v56  ;;  %v2061_v59 = vmax.f32 %v1933_v57, 0.0  ;;  %v2125_v60 = vmax.f32 %v1997_v58, 0.0 }
 0x212   : > { %v1461_v61 = vpop.f32.mrb[120].mxu0  ;;  %v1717_v62 = vpop.f32.mrb[120].mxu1 }
 0x213   : > { %2190 = vst.msk [vmem:[%s3248_s29 + $0x1d8] sm:$0xff] %vm2130_vm0, %v2061_v59  ;;  %2254 = vst.msk [vmem:[%s3248_s29 + $0x3d8] sm:$0xff] %vm2130_vm0, %v2125_v60  ;;  %v1799_v0 = vmul.f32 %v3579_v63, %v1461_v61  ;;  %v1863_v2 = vmul.f32 %v3579_v63, %v1717_v62  ;;  %v1463_v3 = vpop.f32.mrb[121].mxu0  ;;  %v1719_v4 = vpop.f32.mrb[121].mxu1 }
 0x214   : > { %v1464_v5 = vpop.f32.mrb[122].mxu0  ;;  %v1720_v6 = vpop.f32.mrb[122].mxu1 }
 0x215   : > { %v1934_v7 = vadd.f32 %v3586_v54, %v1799_v0  ;;  %v1998_v8 = vadd.f32 %v3586_v54, %v1863_v2  ;;  %v1800_v9 = vmul.f32 %v3579_v63, %v1464_v5  ;;  %v1864_v10 = vmul.f32 %v3579_v63, %v1720_v6  ;;  %v1466_v11 = vpop.f32.mrb[123].mxu0  ;;  %v1722_v12 = vpop.f32.mrb[123].mxu1 }
 0x217   : > { %v2062_v13 = vmax.f32 %v1934_v7, 0.0  ;;  %v2126_v14 = vmax.f32 %v1998_v8, 0.0  ;;  %v1935_v15 = vadd.f32 %v3586_v54, %v1800_v9  ;;  %v1999_v16 = vadd.f32 %v3586_v54, %v1864_v10 }
 0x219   : > { %2191 = vst.msk [vmem:[%s3248_s29 + $0x1e0] sm:$0xff] %vm2130_vm0, %v2062_v13  ;;  %2255 = vst.msk [vmem:[%s3248_s29 + $0x3e0] sm:$0xff] %vm2130_vm0, %v2126_v14  ;;  %v2063_v17 = vmax.f32 %v1935_v15, 0.0  ;;  %v2127_v18 = vmax.f32 %v1999_v16, 0.0 }
 0x21a   : > { %v1469_v19 = vpop.f32.mrb[124].mxu0  ;;  %v1725_v20 = vpop.f32.mrb[124].mxu1 }
 0x21b   : > { %2192 = vst.msk [vmem:[%s3248_s29 + $0x1e8] sm:$0xff] %vm2130_vm0, %v2063_v17  ;;  %2256 = vst.msk [vmem:[%s3248_s29 + $0x3e8] sm:$0xff] %vm2130_vm0, %v2127_v18  ;;  %v1801_v21 = vmul.f32 %v3579_v63, %v1469_v19  ;;  %v1865_v22 = vmul.f32 %v3579_v63, %v1725_v20  ;;  %v1471_v23 = vpop.f32.mrb[125].mxu0  ;;  %v1727_v24 = vpop.f32.mrb[125].mxu1 }
 0x21c   : > { %v1472_v25 = vpop.f32.mrb[126].mxu0  ;;  %v1728_v26 = vpop.f32.mrb[126].mxu1 }
 0x21d   : > { %v1936_v27 = vadd.f32 %v3586_v54, %v1801_v21  ;;  %v2000_v28 = vadd.f32 %v3586_v54, %v1865_v22  ;;  %v1802_v29 = vmul.f32 %v3579_v63, %v1472_v25  ;;  %v1866_v30 = vmul.f32 %v3579_v63, %v1728_v26  ;;  %v1474_v31 = vpop.f32.mrb[127].mxu0  ;;  %v1730_v32 = vpop.f32.mrb[127].mxu1  ;;  %2266 = sbr.rel (!%p3008_p4) target bundleno = 576 (0x240), region = 40 }
 0x21f   : > { %v2064_v33 = vmax.f32 %v1936_v27, 0.0  ;;  %v2128_v34 = vmax.f32 %v2000_v28, 0.0  ;;  %v1937_v35 = vadd.f32 %v3586_v54, %v1802_v29  ;;  %v2001_v36 = vadd.f32 %v3586_v54, %v1866_v30 }
 0x221   : > { %2193 = vst.msk [vmem:[%s3248_s29 + $0x1f0] sm:$0xff] %vm2130_vm0, %v2064_v33  ;;  %2257 = vst.msk [vmem:[%s3248_s29 + $0x3f0] sm:$0xff] %vm2130_vm0, %v2128_v34  ;;  %v2065_v37 = vmax.f32 %v1937_v35, 0.0  ;;  %v2129_v38 = vmax.f32 %v2001_v36, 0.0 }
 0x223   : > { %2194 = vst.msk [vmem:[%s3248_s29 + $0x1f8] sm:$0xff] %vm2130_vm0, %v2065_v37  ;;  %2258 = vst.msk [vmem:[%s3248_s29 + $0x3f8] sm:$0xff] %vm2130_vm0, %v2129_v38 }
 0x224   : > { %s3861_s9 = smov (!%p2269_p12, %s2268_s9), 128 }
 0x225   : > { %s3785_s10 = sshll.u32 %s3861_s9, 7 }
 0x226   : > { %s2273_s11 = ssub.s32 16384, %s3785_s10 }
 0x227   : > { %2274 = vsyncadd %s3780_s8, %s2273_s11  ;;  %p2552_p13 = scmp.ne.s32.totalorder %s3785_s10, 0  ;;  %s2559_s12 = sshll.u32 %s2929_s18, 14 }
 0x228   : > { %s3794_s14 = scalar_lea.hbm %s3850_s4, %s2559_s12  ;;  %s2280_s5 = sshll.u32 %s3248_s29, 4  ;;  %s3797_s5 = int_to_ptr.vmem [resolvable:$true] %s2280_s5 }
 0x229   : > { %s2859_s21 = scalar_lea.vmem %s3797_s5, %s3785_s10  ;;  %s2940_s22 = smov [#allocation2]  }
 0x22a   : > { %p2860_p0 = scmp.ne.s32.totalorder %s3797_s5, %s2859_s21  ;;  %s2863_s24 = sshll.u32 %s2940_s22, 4  ;;  %s2864_s24 = int_to_ptr.vmem [resolvable:$false] %s2863_s24 }
 0x22b   : > { %s2865_s18 = scalar_lea.vmem %s2864_s24, 32768  ;;  %p2866_p3 = scmp.lt.s32.totalorder %s3797_s5, %s2864_s24 }
 0x22c   : > { %p2861_p1 = pnand %p2860_p0, %p2552_p13  ;;  %p2867_p4 = scmp.lt.s32.totalorder %s2865_s18, %s2859_s21 }
 0x22e   : > { %p2862_p2 = pneg %p2861_p1  ;;  %p2868_p5 = por %p2867_p4, %p2866_p3 }
 0x230   : > { %p2869_p6 = pnand %p2868_p5, %p2862_p2 }
 0x232   : > { %2872 = shalt.err (!%p2869_p6)
}
 0x233   : > { %s2873_s29 = scalar_lea.hbm %s3794_s14, %s3785_s10  ;;  %s2877_s6 = scalar_lea.hbm %s3850_s4, 387200 }
 0x234   : > { %p2874_p7 = scmp.ne.s32.totalorder %s3794_s14, %s2873_s29  ;;  %p2878_p11 = scmp.lt.u32.totalorder %s3794_s14, %s3850_s4 }
 0x235   : > { %p2879_p12 = scmp.lt.u32.totalorder %s2877_s6, %s2873_s29  ;;  %p2881_p1 = scmp.lt.u32.totalorder %s2873_s29, %s3794_s14 }
 0x236   : > { %p2875_p9 = pnand %p2874_p7, %p2552_p13 }
 0x237   : > { %p2880_p0 = por %p2879_p12, %p2878_p11 }
 0x238   : > { %p2876_p10 = pneg %p2875_p9 }
 0x239   : > { %p2882_p2 = por %p2881_p1, %p2880_p0 }
 0x23b   : > { %p2883_p3 = pnand %p2882_p2, %p2876_p10 }
 0x23d   : > { %2886 = shalt.err (!%p2883_p3)
}
 0x23e   : > { %s2941_s11 = smov 128   ;;  %s2942_s12 = smov 8  }
 0x23f   : > { %2286 = dma.vmem_to_hbm [thread:$0]  (%p2552_p13), %s3797_s5, %s3785_s10, %s3794_s14, %s3780_s8, %s2941_s11, %s2941_s11, %s2942_s12  }
 0x240 PF: > { %p2597_p4 = scmp.ge.s32.totalorder %s2937_s20, 2  ;;  %s2295_s13 = sand.u32 1, %s2917_s15  }
 0x241   : > { %s2296_s25 = scalar_lea.sflag [#allocation3], %s2295_s13 }
 0x242   : > { %p2594_p5 = pnand %p2597_p4, %p3015_p8 }
 0x244   : > { %2912 = dma.done.wait (!%p2594_p5), %s2296_s25, 16384  }
 0x245   : > { %2914 = vsyncadd (!%p2594_p5), %s2296_s25, 4294950912  ;;  %s17_s20 = sadd.s32 1, %s2937_s20   ;;  %s3853_s15 = smov %s2921_s16 }
 0x246   : > { %p14_p6 = scmp.ge.s32.totalorder %s17_s20, 26   ;;  %s3854_s16 = smov %s2925_s17 }
 0x247   : > { %s3855_s17 = smov %s3021_s28  ;;  %s3856_s18 = smov %s2933_s19 }
 0x248   : > { %s3857_s19 = smov %s3859_s23  ;;  %16 = sbr.rel (!%p14_p6) target bundleno = 4 (0x4), region = 80 }
 0x24f   :  { %2301 = vsyncpa [#allocation3], 1 }
 0x250   :  { %2303 = vsyncpa [#allocation3 + $0x1], 1 }

</bundles_post_ra>
